<compile_context>
chip_gen: v6e
topology: v6e:2x2x1
jax: 0.10.0
libtpu: 0.0.40
codegen_flags: <defaults>
</compile_context>

<pallas_src>
import functools

import jax
import jax.numpy as jnp
import numpy as np
from jax.experimental import pallas as pl
from jax.experimental.pallas import tpu as pltpu


# ------------------------------ fused kernel --------------------------------


def _stage_kernel(x_ref, wtp_ref, wg_ref, w1_ref, w2_ref, b_ref, o_ref, att_sc,
                  *, stage_num, cp):
    """Whole Stage for one batch element, channels-first (C, N) layout.

    x_ref:   (C, N)            input activations
    wtp_ref: (2*Cp, C)         stacked [Wt^T ; Wp^T]
    wg_ref:  (S, Cp, C)        per-stage Wg^T
    w1_ref:  (S, C, Cp)        per-stage W1^T with BN scale folded in
    w2_ref:  (S, C, Cp)        per-stage W2^T with BN scale folded in
    b_ref:   (S, C, 1)         per-stage folded BN bias
    o_ref:   (C, N)            output activations
    att_sc:  (N, N) VMEM       unnormalized symmetric affinity (resident)
    """
    x = x_ref[...]                                                   # (C, N)

    # --- DotKernel: t/p projections as one merged matmul -------------------
    tp = jnp.dot(wtp_ref[...], x, preferred_element_type=jnp.float32)
    tp = jnp.maximum(tp, 0.0)                                        # relu
    t = tp[:cp, :]                                                   # (Cp, N)
    p = tp[cp:, :]                                                   # (Cp, N)

    # att = 0.5 * (t^T p + p^T t)  — symmetrization via a second MXU matmul
    # instead of an (N, N) XLU transpose.
    a1 = jax.lax.dot_general(t, p, (((0,), (0,)), ((), ())),
                             preferred_element_type=jnp.float32)     # (N, N)
    a2 = jax.lax.dot_general(p, t, (((0,), (0,)), ((), ())),
                             preferred_element_type=jnp.float32)     # (N, N)
    att_sc[...] = 0.5 * (a1 + a2)

    # Degree normalization: att is symmetric, so column sums == row sums.
    # Keep D^-1/2 as a (1, N) lane vector and fold it into each stage's
    # att @ g product instead of materializing the normalized att.
    d = jnp.sum(att_sc[...], axis=0, keepdims=True)                  # (1, N)
    nz = d != 0.0
    dinv = jnp.where(nz, jnp.sqrt(1.0 / jnp.where(nz, d, 1.0)), 0.0)

    # --- stage_num x SNLUnit, sequential, everything VMEM-resident ---------
    out = x
    for s in range(stage_num):                                       # static unroll
        g = jnp.dot(wg_ref[s], out, preferred_element_type=jnp.float32)   # (Cp, N)
        # ag = g @ (D^-1/2 A D^-1/2)  ==  ((g * dinv) @ A) * dinv
        ag = jnp.dot(g * dinv, att_sc[...],
                     preferred_element_type=jnp.float32) * dinv           # (Cp, N)
        y = (jnp.dot(w1_ref[s], g, preferred_element_type=jnp.float32)
             + jnp.dot(w2_ref[s], ag, preferred_element_type=jnp.float32)
             + b_ref[s])                                                   # (C, N)
        out = y + out                                                      # residual
    o_ref[...] = out


def _fused_stage(xf, wtp, wg_all, w1_all, w2_all, b_all, *, stage_num, cp):
    B, C, N = xf.shape
    kernel = functools.partial(_stage_kernel, stage_num=stage_num, cp=cp)
    return pl.pallas_call(
        kernel,
        out_shape=jax.ShapeDtypeStruct((B, C, N), jnp.float32),
        grid=(B,),
        in_specs=[
            pl.BlockSpec((None, C, N), lambda b: (b, 0, 0)),
            pl.BlockSpec((2 * cp, C), lambda b: (0, 0)),
            pl.BlockSpec((stage_num, cp, C), lambda b: (0, 0, 0)),
            pl.BlockSpec((stage_num, C, cp), lambda b: (0, 0, 0)),
            pl.BlockSpec((stage_num, C, cp), lambda b: (0, 0, 0)),
            pl.BlockSpec((stage_num, C, 1), lambda b: (0, 0, 0)),
        ],
        out_specs=pl.BlockSpec((None, C, N), lambda b: (b, 0, 0)),
        scratch_shapes=[pltpu.VMEM((N, N), jnp.float32)],
        compiler_params=pltpu.CompilerParams(
            # batch axis shards across TensorCores (v7x megacore).
            # TODO(synk): for B == 1 an N-row-tile parallel axis would be
            # needed to occupy both v7x TCs.
            dimension_semantics=("parallel",),
        ),
    )(xf, wtp, wg_all, w1_all, w2_all, b_all)


# ------------------------------ host wrapper ---------------------------------


@jax.jit
def stage_forward(x_nchw, wt, wp, stage_params):
    """Stage.forward (nl_type='snl').  x_nchw: (B, Cin, H, W) float32."""
    B, C, H, W = x_nchw.shape
    N = H * W
    Cp = wt.shape[1]
    S = len(stage_params)

    xf = x_nchw.reshape(B, C, N)                       # channels-first, no transpose

    # Merge t/p projection weights: rows [0:Cp) = Wt^T, [Cp:2Cp) = Wp^T.
    wtp = jnp.concatenate([wt.T, wp.T], axis=0)        # (2Cp, C)

    # Stack per-stage weights; fold eval-mode BatchNorm into W1/W2 + bias.
    wg_l, w1_l, w2_l, b_l = [], [], [], []
    for (wg, w1, w2, gamma, beta, mean, var) in stage_params:
        scale = gamma[0] * jax.lax.rsqrt(var[0] + 1e-5)       # (C,)
        wg_l.append(wg.T)                                      # (Cp, C)
        w1_l.append(w1.T * scale[:, None])                     # (C, Cp)
        w2_l.append(w2.T * scale[:, None])                     # (C, Cp)
        b_l.append((beta[0] - mean[0] * scale)[:, None])       # (C, 1)
    wg_all = jnp.stack(wg_l, axis=0)                           # (S, Cp, C)
    w1_all = jnp.stack(w1_l, axis=0)                           # (S, C, Cp)
    w2_all = jnp.stack(w2_l, axis=0)                           # (S, C, Cp)
    b_all = jnp.stack(b_l, axis=0)                             # (S, C, 1)

    out = _fused_stage(xf, wtp, wg_all, w1_all, w2_all, b_all,
                       stage_num=S, cp=Cp)
    return out.reshape(B, C, H, W)


# --------------------------- parameter init ----------------------------------


def init_params(key, inplanes, planes, stage_num):
    """Deterministic synthetic weights.

    1x1 conv weights (out, in, 1, 1) are stored pre-transposed as (in, out)
    for the reference; the wrapper re-orients them for the kernel.
    """
    keys = jax.random.split(key, 2 + 3 * stage_num)
    s_in = 1.0 / np.sqrt(inplanes)
    s_pl = 1.0 / np.sqrt(planes)
    wt = jax.random.normal(keys[0], (inplanes, planes), jnp.float32) * s_in
    wp = jax.random.normal(keys[1], (inplanes, planes), jnp.float32) * s_in
    stage_params = []
    for i in range(stage_num):
        kg, k1, k2 = keys[2 + 3 * i:5 + 3 * i]
        wg = jax.random.normal(kg, (inplanes, planes), jnp.float32) * s_in
        w1 = jax.random.normal(k1, (planes, inplanes), jnp.float32) * s_pl
        w2 = jax.random.normal(k2, (planes, inplanes), jnp.float32) * s_pl
        gamma = jnp.ones((1, inplanes), jnp.float32)
        beta = jnp.zeros((1, inplanes), jnp.float32)
        mean = jnp.zeros((1, inplanes), jnp.float32)
        var = jnp.ones((1, inplanes), jnp.float32)
        stage_params.append((wg, w1, w2, gamma, beta, mean, var))
    return wt, wp, tuple(stage_params)


# --------------------------- pure-JAX reference -------------------------------


def ref_forward(x_nchw, wt, wp, stage_params):
    B, C, H, W = x_nchw.shape
    N = H * W
    xf = jnp.transpose(x_nchw.reshape(B, C, N), (0, 2, 1))   # (B, N, C)
    t = jnp.maximum(jnp.einsum('bnc,cp->bnp', xf, wt), 0.0)
    p = jnp.maximum(jnp.einsum('bnc,cp->bnp', xf, wp), 0.0)
    att = jnp.einsum('bnp,bmp->bnm', t, p)
    att = 0.5 * (att + jnp.transpose(att, (0, 2, 1)))
    d = jnp.sum(att, axis=2)
    dinv = jnp.where(d != 0, jnp.sqrt(1.0 / jnp.where(d != 0, d, 1.0)), 0.0)
    att = att * dinv[:, None, :] * dinv[:, :, None]
    out = xf
    for (wg, w1, w2, gamma, beta, mean, var) in stage_params:
        g = jnp.einsum('bnc,cp->bnp', out, wg)
        ag = jnp.einsum('bnm,bmp->bnp', att, g)
        y = jnp.einsum('bnp,pc->bnc', g, w1) + jnp.einsum('bnp,pc->bnc', ag, w2)
        y = (y - mean) * jax.lax.rsqrt(var + 1e-5) * gamma + beta
        out = y + out
    return jnp.transpose(out, (0, 2, 1)).reshape(B, C, H, W)


# ------------------------------- main -----------------------------------------


if __name__ == "__main__":
    key = jax.random.PRNGKey(0)
    kx, kp = jax.random.split(key)

    # small shapes consistent with the module: Stage(inplanes=8, planes=4)
    B, Cin, H, W = 2, 8, 16, 16
    planes, stage_num = 4, 5

    x = jax.random.normal(kx, (B, Cin, H, W), jnp.float32)
    wt, wp, stage_params = init_params(kp, Cin, planes, stage_num)

    out = stage_forward(x, wt, wp, stage_params)
    out = jax.block_until_ready(out)

    ref = ref_forward(x, wt, wp, stage_params)
    np.testing.assert_allclose(np.asarray(out), np.asarray(ref), atol=1e-2, rtol=1e-2)

    print("KERNEL_OK")
</pallas_src>

<mosaic_0001>
module attributes {stable_mosaic.version = 11 : i64} {
  func.func @_stage_kernel(%arg0: i32, %arg1: memref<1x8x256xf32, #tpu.memory_space<vmem>>, %arg2: memref<8x8xf32, #tpu.memory_space<vmem>>, %arg3: memref<5x4x8xf32, #tpu.memory_space<vmem>>, %arg4: memref<5x8x4xf32, #tpu.memory_space<vmem>>, %arg5: memref<5x8x4xf32, #tpu.memory_space<vmem>>, %arg6: memref<5x8x1xf32, #tpu.memory_space<vmem>>, %arg7: memref<1x8x256xf32, #tpu.memory_space<vmem>>, %arg8: memref<256x256xf32, #tpu.memory_space<vmem>>) attributes {dimension_semantics = [#tpu.dimension_semantics<parallel>], iteration_bounds = array<i64: 2>, scalar_prefetch = 0 : i64, scratch_operands = 1 : i64, tpu.core_type = #tpu.core_type<tc>, window_params = [{transform_indices = @transform_0, window_bounds = array<i64: 1, 8, 256>}, {pipeline_mode = #tpu.pipeline_mode<synchronous>, transform_indices = @transform_1, window_bounds = array<i64: 8, 8>}, {pipeline_mode = #tpu.pipeline_mode<synchronous>, transform_indices = @transform_2, window_bounds = array<i64: 5, 4, 8>}, {pipeline_mode = #tpu.pipeline_mode<synchronous>, transform_indices = @transform_3, window_bounds = array<i64: 5, 8, 4>}, {pipeline_mode = #tpu.pipeline_mode<synchronous>, transform_indices = @transform_4, window_bounds = array<i64: 5, 8, 4>}, {pipeline_mode = #tpu.pipeline_mode<synchronous>, transform_indices = @transform_5, window_bounds = array<i64: 5, 8, 1>}, {transform_indices = @transform_6, window_bounds = array<i64: 1, 8, 256>}]} {
    %c0 = arith.constant 0 : index
    %c0_0 = arith.constant 0 : index
    %c0_1 = arith.constant 0 : index
    %0 = vector.load %arg1[%c0, %c0_0, %c0_1] : memref<1x8x256xf32, #tpu.memory_space<vmem>>, vector<1x8x256xf32>
    %1 = vector.shape_cast %0 : vector<1x8x256xf32> to vector<8x256xf32>
    %c0_2 = arith.constant 0 : index
    %c0_3 = arith.constant 0 : index
    %2 = vector.load %arg2[%c0_2, %c0_3] : memref<8x8xf32, #tpu.memory_space<vmem>>, vector<8x8xf32>
    %cst = arith.constant dense<0.000000e+00> : vector<8x256xf32>
    %3 = tpu.matmul %2, %1, %cst {dimension_numbers = #tpu.dot_dimension_numbers<[1], [0], [0], [1], [0, 0, 1, 1], [], []>} : vector<8x8xf32>, vector<8x256xf32>, vector<8x256xf32> -> vector<8x256xf32>
    %cst_4 = arith.constant 0.000000e+00 : f32
    %4 = vector.broadcast %cst_4 : f32 to vector<8x256xf32>
    %5 = arith.maximumf %3, %4 : vector<8x256xf32>
    %6 = vector.extract_strided_slice %5 {offsets = [0, 0], sizes = [4, 256], strides = [1, 1]} : vector<8x256xf32> to vector<4x256xf32>
    %7 = vector.extract_strided_slice %5 {offsets = [4, 0], sizes = [4, 256], strides = [1, 1]} : vector<8x256xf32> to vector<4x256xf32>
    %cst_5 = arith.constant dense<0.000000e+00> : vector<256x256xf32>
    %8 = tpu.matmul %6, %7, %cst_5 {dimension_numbers = #tpu.dot_dimension_numbers<[0], [0], [1], [1], [0, 1, 1, 1], [], []>} : vector<4x256xf32>, vector<4x256xf32>, vector<256x256xf32> -> vector<256x256xf32>
    %cst_6 = arith.constant dense<0.000000e+00> : vector<256x256xf32>
    %9 = tpu.matmul %7, %6, %cst_6 {dimension_numbers = #tpu.dot_dimension_numbers<[0], [0], [1], [1], [0, 1, 1, 1], [], []>} : vector<4x256xf32>, vector<4x256xf32>, vector<256x256xf32> -> vector<256x256xf32>
    %10 = arith.addf %8, %9 : vector<256x256xf32>
    %cst_7 = arith.constant 5.000000e-01 : f32
    %11 = vector.broadcast %cst_7 : f32 to vector<256x256xf32>
    %12 = arith.mulf %11, %10 : vector<256x256xf32>
    %c0_8 = arith.constant 0 : index
    %c0_9 = arith.constant 0 : index
    %13 = vector.load %arg8[%c0_8, %c0_9] : memref<256x256xf32, #tpu.memory_space<vmem>>, vector<256x256xf32>
    tpu.vector_store %arg8[%c0_8, %c0_9], %12 {strides = array<i32>} : memref<256x256xf32, #tpu.memory_space<vmem>>, vector<256x256xf32>,
    %c0_10 = arith.constant 0 : index
    %c0_11 = arith.constant 0 : index
    %14 = vector.load %arg8[%c0_10, %c0_11] : memref<256x256xf32, #tpu.memory_space<vmem>>, vector<256x256xf32>
    %cst_12 = arith.constant dense<0.000000e+00> : vector<256xf32>
    %15 = vector.multi_reduction <add>, %14, %cst_12 [0] : vector<256x256xf32> to vector<256xf32>
    %16 = vector.shape_cast %15 : vector<256xf32> to vector<1x256xf32>
    %cst_13 = arith.constant 0.000000e+00 : f32
    %17 = vector.broadcast %cst_13 : f32 to vector<1x256xf32>
    %18 = arith.cmpf one, %16, %17 : vector<1x256xf32>
    %cst_14 = arith.constant 1.000000e+00 : f32
    %19 = vector.broadcast %cst_14 : f32 to vector<1x256xf32>
    %20 = arith.select %18, %16, %19 : vector<1x256xi1>, vector<1x256xf32>
    %cst_15 = arith.constant 1.000000e+00 : f32
    %21 = vector.broadcast %cst_15 : f32 to vector<1x256xf32>
    %22 = arith.divf %21, %20 : vector<1x256xf32>
    %23 = math.sqrt %22 : vector<1x256xf32>
    %cst_16 = arith.constant 0.000000e+00 : f32
    %24 = vector.broadcast %cst_16 : f32 to vector<1x256xf32>
    %25 = arith.select %18, %23, %24 : vector<1x256xi1>, vector<1x256xf32>
    %c0_17 = arith.constant 0 : index
    %c0_18 = arith.constant 0 : index
    %c0_19 = arith.constant 0 : index
    %26 = vector.load %arg3[%c0_17, %c0_18, %c0_19] : memref<5x4x8xf32, #tpu.memory_space<vmem>>, vector<1x4x8xf32>
    %27 = vector.shape_cast %26 : vector<1x4x8xf32> to vector<4x8xf32>
    %cst_20 = arith.constant dense<0.000000e+00> : vector<4x256xf32>
    %28 = tpu.matmul %27, %1, %cst_20 {dimension_numbers = #tpu.dot_dimension_numbers<[1], [0], [0], [1], [0, 0, 1, 1], [], []>} : vector<4x8xf32>, vector<8x256xf32>, vector<4x256xf32> -> vector<4x256xf32>
    %29 = vector.broadcast %25 : vector<1x256xf32> to vector<4x256xf32>
    %30 = arith.mulf %28, %29 : vector<4x256xf32>
    %c0_21 = arith.constant 0 : index
    %c0_22 = arith.constant 0 : index
    %31 = vector.load %arg8[%c0_21, %c0_22] : memref<256x256xf32, #tpu.memory_space<vmem>>, vector<256x256xf32>
    %cst_23 = arith.constant dense<0.000000e+00> : vector<4x256xf32>
    %32 = tpu.matmul %30, %31, %cst_23 {dimension_numbers = #tpu.dot_dimension_numbers<[1], [0], [0], [1], [0, 0, 1, 1], [], []>} : vector<4x256xf32>, vector<256x256xf32>, vector<4x256xf32> -> vector<4x256xf32>
    %33 = vector.broadcast %25 : vector<1x256xf32> to vector<4x256xf32>
    %34 = arith.mulf %32, %33 : vector<4x256xf32>
    %c0_24 = arith.constant 0 : index
    %c0_25 = arith.constant 0 : index
    %c0_26 = arith.constant 0 : index
    %35 = vector.load %arg4[%c0_24, %c0_25, %c0_26] : memref<5x8x4xf32, #tpu.memory_space<vmem>>, vector<1x8x4xf32>
    %36 = vector.shape_cast %35 : vector<1x8x4xf32> to vector<8x4xf32>
    %cst_27 = arith.constant dense<0.000000e+00> : vector<8x256xf32>
    %37 = tpu.matmul %36, %28, %cst_27 {dimension_numbers = #tpu.dot_dimension_numbers<[1], [0], [0], [1], [0, 0, 1, 1], [], []>} : vector<8x4xf32>, vector<4x256xf32>, vector<8x256xf32> -> vector<8x256xf32>
    %c0_28 = arith.constant 0 : index
    %c0_29 = arith.constant 0 : index
    %c0_30 = arith.constant 0 : index
    %38 = vector.load %arg5[%c0_28, %c0_29, %c0_30] : memref<5x8x4xf32, #tpu.memory_space<vmem>>, vector<1x8x4xf32>
    %39 = vector.shape_cast %38 : vector<1x8x4xf32> to vector<8x4xf32>
    %cst_31 = arith.constant dense<0.000000e+00> : vector<8x256xf32>
    %40 = tpu.matmul %39, %34, %cst_31 {dimension_numbers = #tpu.dot_dimension_numbers<[1], [0], [0], [1], [0, 0, 1, 1], [], []>} : vector<8x4xf32>, vector<4x256xf32>, vector<8x256xf32> -> vector<8x256xf32>
    %41 = arith.addf %37, %40 : vector<8x256xf32>
    %c0_32 = arith.constant 0 : index
    %c0_33 = arith.constant 0 : index
    %c0_34 = arith.constant 0 : index
    %42 = vector.load %arg6[%c0_32, %c0_33, %c0_34] : memref<5x8x1xf32, #tpu.memory_space<vmem>>, vector<1x8x1xf32>
    %43 = vector.shape_cast %42 : vector<1x8x1xf32> to vector<8x1xf32>
    %44 = vector.broadcast %43 : vector<8x1xf32> to vector<8x256xf32>
    %45 = arith.addf %41, %44 : vector<8x256xf32>
    %46 = arith.addf %45, %1 : vector<8x256xf32>
    %c1 = arith.constant 1 : index
    %c0_35 = arith.constant 0 : index
    %c0_36 = arith.constant 0 : index
    %47 = vector.load %arg3[%c1, %c0_35, %c0_36] : memref<5x4x8xf32, #tpu.memory_space<vmem>>, vector<1x4x8xf32>
    %48 = vector.shape_cast %47 : vector<1x4x8xf32> to vector<4x8xf32>
    %cst_37 = arith.constant dense<0.000000e+00> : vector<4x256xf32>
    %49 = tpu.matmul %48, %46, %cst_37 {dimension_numbers = #tpu.dot_dimension_numbers<[1], [0], [0], [1], [0, 0, 1, 1], [], []>} : vector<4x8xf32>, vector<8x256xf32>, vector<4x256xf32> -> vector<4x256xf32>
    %50 = vector.broadcast %25 : vector<1x256xf32> to vector<4x256xf32>
    %51 = arith.mulf %49, %50 : vector<4x256xf32>
    %c0_38 = arith.constant 0 : index
    %c0_39 = arith.constant 0 : index
    %52 = vector.load %arg8[%c0_38, %c0_39] : memref<256x256xf32, #tpu.memory_space<vmem>>, vector<256x256xf32>
    %cst_40 = arith.constant dense<0.000000e+00> : vector<4x256xf32>
    %53 = tpu.matmul %51, %52, %cst_40 {dimension_numbers = #tpu.dot_dimension_numbers<[1], [0], [0], [1], [0, 0, 1, 1], [], []>} : vector<4x256xf32>, vector<256x256xf32>, vector<4x256xf32> -> vector<4x256xf32>
    %54 = vector.broadcast %25 : vector<1x256xf32> to vector<4x256xf32>
    %55 = arith.mulf %53, %54 : vector<4x256xf32>
    %c1_41 = arith.constant 1 : index
    %c0_42 = arith.constant 0 : index
    %c0_43 = arith.constant 0 : index
    %56 = vector.load %arg4[%c1_41, %c0_42, %c0_43] : memref<5x8x4xf32, #tpu.memory_space<vmem>>, vector<1x8x4xf32>
    %57 = vector.shape_cast %56 : vector<1x8x4xf32> to vector<8x4xf32>
    %cst_44 = arith.constant dense<0.000000e+00> : vector<8x256xf32>
    %58 = tpu.matmul %57, %49, %cst_44 {dimension_numbers = #tpu.dot_dimension_numbers<[1], [0], [0], [1], [0, 0, 1, 1], [], []>} : vector<8x4xf32>, vector<4x256xf32>, vector<8x256xf32> -> vector<8x256xf32>
    %c1_45 = arith.constant 1 : index
    %c0_46 = arith.constant 0 : index
    %c0_47 = arith.constant 0 : index
    %59 = vector.load %arg5[%c1_45, %c0_46, %c0_47] : memref<5x8x4xf32, #tpu.memory_space<vmem>>, vector<1x8x4xf32>
    %60 = vector.shape_cast %59 : vector<1x8x4xf32> to vector<8x4xf32>
    %cst_48 = arith.constant dense<0.000000e+00> : vector<8x256xf32>
    %61 = tpu.matmul %60, %55, %cst_48 {dimension_numbers = #tpu.dot_dimension_numbers<[1], [0], [0], [1], [0, 0, 1, 1], [], []>} : vector<8x4xf32>, vector<4x256xf32>, vector<8x256xf32> -> vector<8x256xf32>
    %62 = arith.addf %58, %61 : vector<8x256xf32>
    %c1_49 = arith.constant 1 : index
    %c0_50 = arith.constant 0 : index
    %c0_51 = arith.constant 0 : index
    %63 = vector.load %arg6[%c1_49, %c0_50, %c0_51] : memref<5x8x1xf32, #tpu.memory_space<vmem>>, vector<1x8x1xf32>
    %64 = vector.shape_cast %63 : vector<1x8x1xf32> to vector<8x1xf32>
    %65 = vector.broadcast %64 : vector<8x1xf32> to vector<8x256xf32>
    %66 = arith.addf %62, %65 : vector<8x256xf32>
    %67 = arith.addf %66, %46 : vector<8x256xf32>
    %c2 = arith.constant 2 : index
    %c0_52 = arith.constant 0 : index
    %c0_53 = arith.constant 0 : index
    %68 = vector.load %arg3[%c2, %c0_52, %c0_53] : memref<5x4x8xf32, #tpu.memory_space<vmem>>, vector<1x4x8xf32>
    %69 = vector.shape_cast %68 : vector<1x4x8xf32> to vector<4x8xf32>
    %cst_54 = arith.constant dense<0.000000e+00> : vector<4x256xf32>
    %70 = tpu.matmul %69, %67, %cst_54 {dimension_numbers = #tpu.dot_dimension_numbers<[1], [0], [0], [1], [0, 0, 1, 1], [], []>} : vector<4x8xf32>, vector<8x256xf32>, vector<4x256xf32> -> vector<4x256xf32>
    %71 = vector.broadcast %25 : vector<1x256xf32> to vector<4x256xf32>
    %72 = arith.mulf %70, %71 : vector<4x256xf32>
    %c0_55 = arith.constant 0 : index
    %c0_56 = arith.constant 0 : index
    %73 = vector.load %arg8[%c0_55, %c0_56] : memref<256x256xf32, #tpu.memory_space<vmem>>, vector<256x256xf32>
    %cst_57 = arith.constant dense<0.000000e+00> : vector<4x256xf32>
    %74 = tpu.matmul %72, %73, %cst_57 {dimension_numbers = #tpu.dot_dimension_numbers<[1], [0], [0], [1], [0, 0, 1, 1], [], []>} : vector<4x256xf32>, vector<256x256xf32>, vector<4x256xf32> -> vector<4x256xf32>
    %75 = vector.broadcast %25 : vector<1x256xf32> to vector<4x256xf32>
    %76 = arith.mulf %74, %75 : vector<4x256xf32>
    %c2_58 = arith.constant 2 : index
    %c0_59 = arith.constant 0 : index
    %c0_60 = arith.constant 0 : index
    %77 = vector.load %arg4[%c2_58, %c0_59, %c0_60] : memref<5x8x4xf32, #tpu.memory_space<vmem>>, vector<1x8x4xf32>
    %78 = vector.shape_cast %77 : vector<1x8x4xf32> to vector<8x4xf32>
    %cst_61 = arith.constant dense<0.000000e+00> : vector<8x256xf32>
    %79 = tpu.matmul %78, %70, %cst_61 {dimension_numbers = #tpu.dot_dimension_numbers<[1], [0], [0], [1], [0, 0, 1, 1], [], []>} : vector<8x4xf32>, vector<4x256xf32>, vector<8x256xf32> -> vector<8x256xf32>
    %c2_62 = arith.constant 2 : index
    %c0_63 = arith.constant 0 : index
    %c0_64 = arith.constant 0 : index
    %80 = vector.load %arg5[%c2_62, %c0_63, %c0_64] : memref<5x8x4xf32, #tpu.memory_space<vmem>>, vector<1x8x4xf32>
    %81 = vector.shape_cast %80 : vector<1x8x4xf32> to vector<8x4xf32>
    %cst_65 = arith.constant dense<0.000000e+00> : vector<8x256xf32>
    %82 = tpu.matmul %81, %76, %cst_65 {dimension_numbers = #tpu.dot_dimension_numbers<[1], [0], [0], [1], [0, 0, 1, 1], [], []>} : vector<8x4xf32>, vector<4x256xf32>, vector<8x256xf32> -> vector<8x256xf32>
    %83 = arith.addf %79, %82 : vector<8x256xf32>
    %c2_66 = arith.constant 2 : index
    %c0_67 = arith.constant 0 : index
    %c0_68 = arith.constant 0 : index
    %84 = vector.load %arg6[%c2_66, %c0_67, %c0_68] : memref<5x8x1xf32, #tpu.memory_space<vmem>>, vector<1x8x1xf32>
    %85 = vector.shape_cast %84 : vector<1x8x1xf32> to vector<8x1xf32>
    %86 = vector.broadcast %85 : vector<8x1xf32> to vector<8x256xf32>
    %87 = arith.addf %83, %86 : vector<8x256xf32>
    %88 = arith.addf %87, %67 : vector<8x256xf32>
    %c3 = arith.constant 3 : index
    %c0_69 = arith.constant 0 : index
    %c0_70 = arith.constant 0 : index
    %89 = vector.load %arg3[%c3, %c0_69, %c0_70] : memref<5x4x8xf32, #tpu.memory_space<vmem>>, vector<1x4x8xf32>
    %90 = vector.shape_cast %89 : vector<1x4x8xf32> to vector<4x8xf32>
    %cst_71 = arith.constant dense<0.000000e+00> : vector<4x256xf32>
    %91 = tpu.matmul %90, %88, %cst_71 {dimension_numbers = #tpu.dot_dimension_numbers<[1], [0], [0], [1], [0, 0, 1, 1], [], []>} : vector<4x8xf32>, vector<8x256xf32>, vector<4x256xf32> -> vector<4x256xf32>
    %92 = vector.broadcast %25 : vector<1x256xf32> to vector<4x256xf32>
    %93 = arith.mulf %91, %92 : vector<4x256xf32>
    %c0_72 = arith.constant 0 : index
    %c0_73 = arith.constant 0 : index
    %94 = vector.load %arg8[%c0_72, %c0_73] : memref<256x256xf32, #tpu.memory_space<vmem>>, vector<256x256xf32>
    %cst_74 = arith.constant dense<0.000000e+00> : vector<4x256xf32>
    %95 = tpu.matmul %93, %94, %cst_74 {dimension_numbers = #tpu.dot_dimension_numbers<[1], [0], [0], [1], [0, 0, 1, 1], [], []>} : vector<4x256xf32>, vector<256x256xf32>, vector<4x256xf32> -> vector<4x256xf32>
    %96 = vector.broadcast %25 : vector<1x256xf32> to vector<4x256xf32>
    %97 = arith.mulf %95, %96 : vector<4x256xf32>
    %c3_75 = arith.constant 3 : index
    %c0_76 = arith.constant 0 : index
    %c0_77 = arith.constant 0 : index
    %98 = vector.load %arg4[%c3_75, %c0_76, %c0_77] : memref<5x8x4xf32, #tpu.memory_space<vmem>>, vector<1x8x4xf32>
    %99 = vector.shape_cast %98 : vector<1x8x4xf32> to vector<8x4xf32>
    %cst_78 = arith.constant dense<0.000000e+00> : vector<8x256xf32>
    %100 = tpu.matmul %99, %91, %cst_78 {dimension_numbers = #tpu.dot_dimension_numbers<[1], [0], [0], [1], [0, 0, 1, 1], [], []>} : vector<8x4xf32>, vector<4x256xf32>, vector<8x256xf32> -> vector<8x256xf32>
    %c3_79 = arith.constant 3 : index
    %c0_80 = arith.constant 0 : index
    %c0_81 = arith.constant 0 : index
    %101 = vector.load %arg5[%c3_79, %c0_80, %c0_81] : memref<5x8x4xf32, #tpu.memory_space<vmem>>, vector<1x8x4xf32>
    %102 = vector.shape_cast %101 : vector<1x8x4xf32> to vector<8x4xf32>
    %cst_82 = arith.constant dense<0.000000e+00> : vector<8x256xf32>
    %103 = tpu.matmul %102, %97, %cst_82 {dimension_numbers = #tpu.dot_dimension_numbers<[1], [0], [0], [1], [0, 0, 1, 1], [], []>} : vector<8x4xf32>, vector<4x256xf32>, vector<8x256xf32> -> vector<8x256xf32>
    %104 = arith.addf %100, %103 : vector<8x256xf32>
    %c3_83 = arith.constant 3 : index
    %c0_84 = arith.constant 0 : index
    %c0_85 = arith.constant 0 : index
    %105 = vector.load %arg6[%c3_83, %c0_84, %c0_85] : memref<5x8x1xf32, #tpu.memory_space<vmem>>, vector<1x8x1xf32>
    %106 = vector.shape_cast %105 : vector<1x8x1xf32> to vector<8x1xf32>
    %107 = vector.broadcast %106 : vector<8x1xf32> to vector<8x256xf32>
    %108 = arith.addf %104, %107 : vector<8x256xf32>
    %109 = arith.addf %108, %88 : vector<8x256xf32>
    %c4 = arith.constant 4 : index
    %c0_86 = arith.constant 0 : index
    %c0_87 = arith.constant 0 : index
    %110 = vector.load %arg3[%c4, %c0_86, %c0_87] : memref<5x4x8xf32, #tpu.memory_space<vmem>>, vector<1x4x8xf32>
    %111 = vector.shape_cast %110 : vector<1x4x8xf32> to vector<4x8xf32>
    %cst_88 = arith.constant dense<0.000000e+00> : vector<4x256xf32>
    %112 = tpu.matmul %111, %109, %cst_88 {dimension_numbers = #tpu.dot_dimension_numbers<[1], [0], [0], [1], [0, 0, 1, 1], [], []>} : vector<4x8xf32>, vector<8x256xf32>, vector<4x256xf32> -> vector<4x256xf32>
    %113 = vector.broadcast %25 : vector<1x256xf32> to vector<4x256xf32>
    %114 = arith.mulf %112, %113 : vector<4x256xf32>
    %c0_89 = arith.constant 0 : index
    %c0_90 = arith.constant 0 : index
    %115 = vector.load %arg8[%c0_89, %c0_90] : memref<256x256xf32, #tpu.memory_space<vmem>>, vector<256x256xf32>
    %cst_91 = arith.constant dense<0.000000e+00> : vector<4x256xf32>
    %116 = tpu.matmul %114, %115, %cst_91 {dimension_numbers = #tpu.dot_dimension_numbers<[1], [0], [0], [1], [0, 0, 1, 1], [], []>} : vector<4x256xf32>, vector<256x256xf32>, vector<4x256xf32> -> vector<4x256xf32>
    %117 = vector.broadcast %25 : vector<1x256xf32> to vector<4x256xf32>
    %118 = arith.mulf %116, %117 : vector<4x256xf32>
    %c4_92 = arith.constant 4 : index
    %c0_93 = arith.constant 0 : index
    %c0_94 = arith.constant 0 : index
    %119 = vector.load %arg4[%c4_92, %c0_93, %c0_94] : memref<5x8x4xf32, #tpu.memory_space<vmem>>, vector<1x8x4xf32>
    %120 = vector.shape_cast %119 : vector<1x8x4xf32> to vector<8x4xf32>
    %cst_95 = arith.constant dense<0.000000e+00> : vector<8x256xf32>
    %121 = tpu.matmul %120, %112, %cst_95 {dimension_numbers = #tpu.dot_dimension_numbers<[1], [0], [0], [1], [0, 0, 1, 1], [], []>} : vector<8x4xf32>, vector<4x256xf32>, vector<8x256xf32> -> vector<8x256xf32>
    %c4_96 = arith.constant 4 : index
    %c0_97 = arith.constant 0 : index
    %c0_98 = arith.constant 0 : index
    %122 = vector.load %arg5[%c4_96, %c0_97, %c0_98] : memref<5x8x4xf32, #tpu.memory_space<vmem>>, vector<1x8x4xf32>
    %123 = vector.shape_cast %122 : vector<1x8x4xf32> to vector<8x4xf32>
    %cst_99 = arith.constant dense<0.000000e+00> : vector<8x256xf32>
    %124 = tpu.matmul %123, %118, %cst_99 {dimension_numbers = #tpu.dot_dimension_numbers<[1], [0], [0], [1], [0, 0, 1, 1], [], []>} : vector<8x4xf32>, vector<4x256xf32>, vector<8x256xf32> -> vector<8x256xf32>
    %125 = arith.addf %121, %124 : vector<8x256xf32>
    %c4_100 = arith.constant 4 : index
    %c0_101 = arith.constant 0 : index
    %c0_102 = arith.constant 0 : index
    %126 = vector.load %arg6[%c4_100, %c0_101, %c0_102] : memref<5x8x1xf32, #tpu.memory_space<vmem>>, vector<1x8x1xf32>
    %127 = vector.shape_cast %126 : vector<1x8x1xf32> to vector<8x1xf32>
    %128 = vector.broadcast %127 : vector<8x1xf32> to vector<8x256xf32>
    %129 = arith.addf %125, %128 : vector<8x256xf32>
    %130 = arith.addf %129, %109 : vector<8x256xf32>
    %c0_103 = arith.constant 0 : index
    %c0_104 = arith.constant 0 : index
    %c0_105 = arith.constant 0 : index
    %131 = vector.load %arg7[%c0_103, %c0_104, %c0_105] : memref<1x8x256xf32, #tpu.memory_space<vmem>>, vector<1x8x256xf32>
    %132 = vector.shape_cast %131 : vector<1x8x256xf32> to vector<8x256xf32>
    %133 = vector.shape_cast %130 : vector<8x256xf32> to vector<1x8x256xf32>
    tpu.vector_store %arg7[%c0_103, %c0_104, %c0_105], %133 {strides = array<i32>} : memref<1x8x256xf32, #tpu.memory_space<vmem>>, vector<1x8x256xf32>,
    return
  }
  func.func @transform_0(%arg0: i32) -> (i32, i32, i32) {
    %c0_i32 = arith.constant 0 : i32
    %c0_i32_0 = arith.constant 0 : i32
    %c0_i32_1 = arith.constant 0 : i32
    return %arg0, %c0_i32, %c0_i32_0 : i32, i32, i32
  }
  func.func @transform_1(%arg0: i32) -> (i32, i32) {
    %c0_i32 = arith.constant 0 : i32
    %c0_i32_0 = arith.constant 0 : i32
    %c0_i32_1 = arith.constant 0 : i32
    return %c0_i32, %c0_i32_0 : i32, i32
  }
  func.func @transform_2(%arg0: i32) -> (i32, i32, i32) {
    %c0_i32 = arith.constant 0 : i32
    %c0_i32_0 = arith.constant 0 : i32
    %c0_i32_1 = arith.constant 0 : i32
    %c0_i32_2 = arith.constant 0 : i32
    return %c0_i32, %c0_i32_0, %c0_i32_1 : i32, i32, i32
  }
  func.func @transform_3(%arg0: i32) -> (i32, i32, i32) {
    %c0_i32 = arith.constant 0 : i32
    %c0_i32_0 = arith.constant 0 : i32
    %c0_i32_1 = arith.constant 0 : i32
    %c0_i32_2 = arith.constant 0 : i32
    return %c0_i32, %c0_i32_0, %c0_i32_1 : i32, i32, i32
  }
  func.func @transform_4(%arg0: i32) -> (i32, i32, i32) {
    %c0_i32 = arith.constant 0 : i32
    %c0_i32_0 = arith.constant 0 : i32
    %c0_i32_1 = arith.constant 0 : i32
    %c0_i32_2 = arith.constant 0 : i32
    return %c0_i32, %c0_i32_0, %c0_i32_1 : i32, i32, i32
  }
  func.func @transform_5(%arg0: i32) -> (i32, i32, i32) {
    %c0_i32 = arith.constant 0 : i32
    %c0_i32_0 = arith.constant 0 : i32
    %c0_i32_1 = arith.constant 0 : i32
    %c0_i32_2 = arith.constant 0 : i32
    return %c0_i32, %c0_i32_0, %c0_i32_1 : i32, i32, i32
  }
  func.func @transform_6(%arg0: i32) -> (i32, i32, i32) {
    %c0_i32 = arith.constant 0 : i32
    %c0_i32_0 = arith.constant 0 : i32
    %c0_i32_1 = arith.constant 0 : i32
    return %arg0, %c0_i32, %c0_i32_0 : i32, i32, i32
  }
}

</mosaic_0001>

<bundles_post_ra>
// kernel: stage_forward.1
= control target key start
LH: loop header
LB: loop body
LE: loop exit
PB: predicated region body
PF: predicated region fallthrough
CT: control target
= control target key end

     0   :  { %s3355_s21 = smov 0   ;;  %s4427_s0 = inlined_call_operand.vmem [shape: f32[2,8,256], index: 0, kind: input, shape index: {}]   ;;  %s4428_s1 = inlined_call_operand.vmem [shape: f32[8,8], index: 1, kind: input, shape index: {}]   ;;  %s4429_s2 = inlined_call_operand.vmem [shape: f32[5,4,8], index: 2, kind: input, shape index: {}]   ;;  %s4430_s3 = inlined_call_operand.vmem [shape: f32[5,8,4], index: 3, kind: input, shape index: {}]   ;;  %s4431_s4 = inlined_call_operand.vmem [shape: f32[5,8,4], index: 4, kind: input, shape index: {}]   ;;  %s4432_s5 = inlined_call_operand.vmem [shape: f32[5,8,1], index: 5, kind: input, shape index: {}]   ;;  %s4433_s6 = inlined_call_operand.vmem [shape: f32[2,8,256], index: 6, kind: output, shape index: {}]  }
   0x1 LB: > { %s3155_s22 = sadd.s32 4294967295, %s3316_s21   ;;  %p3159_p0 = scmp.ge.s32.totalorder %s3316_s21, 1  ;;  %s3316_s21 = sphi %s3355_s21, %s16_s21  }
   0x2   : > { %p212_p1 = scmp.lt.s32.totalorder %s3316_s21, 3 }
   0x4   : > { %p213_p2 = pnand %p3159_p0, %p212_p1 }
   0x6   : > { %216 = sbr.rel (%p213_p2) target bundleno = 3597 (0xe0d), region = 44 }
   0xb   : > { %p242_p3 = scmp.lt.s32.totalorder %s3155_s22, 1  ;;  %v4434_v0 = vmov 0.0   ;;  %v254_v3 = vld [vmem:[%s4428_s1] sm:$0xff]  ;;  %vm255_vm0 = vcmask 64512   ;;  %vm499_vm1 = vcmask 1043456   ;;  %vm402_vm2 = vcmask 31744  }
   0xc   : > { %323 = vmatprep.mubr.f32.mxu0 %v4434_v0  ;;  %568 = vmatprep.mubr.f32.mxu1 %v4434_v0 }
   0xd   : > { %s4662_s22 = smov (!%p242_p3, %s3155_s22), 1 }
   0xe   : > { %s3286_s23 = sshll.u32 %s4662_s22, 4 }
   0xf   : > { %s3373_s26 = scalar_lea.vmem %s4427_s0, %s3286_s23  ;;  %s251_s29 = scalar_lea.vmem %s4433_s6, %s3286_s23 }
  0x10   : > { %v253_v1 = vld [vmem:[%s3373_s26 + $0x8] sm:$0xff]  ;;  %v252_v2 = vld [vmem:[%s3373_s26] sm:$0xff] }
  0x11   : > { %289 = vmatprep.subr.mxu0 %v253_v1 }
  0x12   : > { %290 = vmatpush1.msra.mxu0 %v252_v2 }
  0x13   : > { %3164 = vmatmul.mubr.msk.f32.vlgmr.msra.gmra.mxu0 %vm255_vm0, %v254_v3 }
  0x14   : > { %989 = vmatprep.mubr.f32.mxu0 %v4434_v0 }
  0xd3   : > { %v325_v4 = vpop.f32.mrf.mxu0 }
  0xd4   : > { %v330_v5 = vmax.f32 %v325_v4, 0.0 }
  0xd5   : > { %v327_v6 = vpop.f32.mrf.mxu0 }
  0xd6   : > { %v331_v7 = vmax.f32 %v327_v6, 0.0  ;;  %v334_v8 = vrot.slane %v330_v5, 4 }
  0xd8   : > { %338 = vxpose.xlu0.b32.start.end [1/1] (short) %v334_v8, 128  ;;  %3165 = vmatprep.subr.msk.mxu1 %vm499_vm1, %v331_v7  ;;  %v335_v9 = vrot.slane %v331_v7, 4 }
  0xd9   : > { %3166 = vmatpush1.msk.msra.mxu1 %vm499_vm1, %v330_v5 }
  0xda   : > { %370 = vxpose.xlu1.b32.start.end [1/1] (short) %v335_v9, 128  ;;  %3199 = vmatprep.subr.msk.mxu0 %vm499_vm1, %v335_v9 }
  0xdb   : > { %3200 = vmatpush1.msk.msra.mxu0 %vm499_vm1, %v334_v8  ;;  %1506 = vmatprep.subr.mxu1 %v253_v1  ;;  %v1472_v1 = vld [vmem:[%s4429_s2] sm:$0xf] }
 0x115   : > { %761 = vxpose.xlu0.b32.start.end [1/1] (short) %v330_v5, 128 }
 0x117   : > { %793 = vxpose.xlu1.b32.start.end [1/1] (short) %v331_v7, 128 }
 0x154   : > { %v354_v10 = vpop.trf.xlu0 }
 0x155   : > { %3167 = vmatmul.mubr.msk.f32.vlgmr.msra.gmra.mxu1 %vm402_vm2, %v354_v10 }
 0x156   : > { %574 = vmatprep.mubr.f32.mxu1 %v4434_v0  ;;  %v386_v11 = vpop.trf.xlu1  ;;  %1507 = vmatpush1.msra.mxu1 %v252_v2 }
 0x158   : > { %v355_v12 = vpop.trf.xlu0 }
 0x159   : > { %3168 = vmatmul.mubr.msk.f32.gmra.mxu1 %vm402_vm2, %v355_v12 }
 0x15a   : > { %580 = vmatprep.mubr.f32.mxu1 %v4434_v0  ;;  %v387_v13 = vpop.trf.xlu1 }
 0x15c   : > { %v356_v14 = vpop.trf.xlu0 }
 0x15d   : > { %3169 = vmatmul.mubr.msk.f32.gmra.mxu1 %vm402_vm2, %v356_v14 }
 0x15e   : > { %586 = vmatprep.mubr.f32.mxu1 %v4434_v0  ;;  %v388_v16 = vpop.trf.xlu1 }
 0x160   : > { %v357_v15 = vpop.trf.xlu0 }
 0x161   : > { %3170 = vmatmul.mubr.msk.f32.gmra.mxu1 %vm402_vm2, %v357_v15 }
 0x162   : > { %592 = vmatprep.mubr.f32.mxu1 %v4434_v0  ;;  %v389_v18 = vpop.trf.xlu1 }
 0x164   : > { %v358_v17 = vpop.trf.xlu0 }
 0x165   : > { %3171 = vmatmul.mubr.msk.f32.gmra.mxu1 %vm402_vm2, %v358_v17 }
 0x166   : > { %598 = vmatprep.mubr.f32.mxu1 %v4434_v0  ;;  %v390_v21 = vpop.trf.xlu1 }
 0x168   : > { %v359_v19 = vpop.trf.xlu0 }
 0x169   : > { %3172 = vmatmul.mubr.msk.f32.gmra.mxu1 %vm402_vm2, %v359_v19 }
 0x16a   : > { %604 = vmatprep.mubr.f32.mxu1 %v4434_v0  ;;  %v391_v23 = vpop.trf.xlu1 }
 0x16c   : > { %v360_v20 = vpop.trf.xlu0 }
 0x16d   : > { %3173 = vmatmul.mubr.msk.f32.gmra.mxu1 %vm402_vm2, %v360_v20 }
 0x16e   : > { %610 = vmatprep.mubr.f32.mxu1 %v4434_v0  ;;  %v392_v26 = vpop.trf.xlu1 }
 0x170   : > { %v361_v22 = vpop.trf.xlu0 }
 0x171   : > { %3174 = vmatmul.mubr.msk.f32.gmra.mxu1 %vm402_vm2, %v361_v22 }
 0x172   : > { %616 = vmatprep.mubr.f32.mxu1 %v4434_v0  ;;  %v393_v28 = vpop.trf.xlu1 }
 0x174   : > { %v362_v24 = vpop.trf.xlu0 }
 0x175   : > { %3175 = vmatmul.mubr.msk.f32.gmra.mxu1 %vm402_vm2, %v362_v24 }
 0x176   : > { %622 = vmatprep.mubr.f32.mxu1 %v4434_v0  ;;  %v394_v31 = vpop.trf.xlu1 }
 0x178   : > { %v363_v25 = vpop.trf.xlu0 }
 0x179   : > { %3176 = vmatmul.mubr.msk.f32.gmra.mxu1 %vm402_vm2, %v363_v25 }
 0x17a   : > { %628 = vmatprep.mubr.f32.mxu1 %v4434_v0  ;;  %v395_v33 = vpop.trf.xlu1 }
 0x17c   : > { %v364_v27 = vpop.trf.xlu0 }
 0x17d   : > { %3177 = vmatmul.mubr.msk.f32.gmra.mxu1 %vm402_vm2, %v364_v27 }
 0x17e   : > { %634 = vmatprep.mubr.f32.mxu1 %v4434_v0  ;;  %v396_v36 = vpop.trf.xlu1 }
 0x180   : > { %v365_v29 = vpop.trf.xlu0 }
 0x181   : > { %3178 = vmatmul.mubr.msk.f32.gmra.mxu1 %vm402_vm2, %v365_v29 }
 0x182   : > { %640 = vmatprep.mubr.f32.mxu1 %v4434_v0  ;;  %v397_v38 = vpop.trf.xlu1 }
 0x184   : > { %v366_v30 = vpop.trf.xlu0 }
 0x185   : > { %3179 = vmatmul.mubr.msk.f32.gmra.mxu1 %vm402_vm2, %v366_v30 }
 0x186   : > { %646 = vmatprep.mubr.f32.mxu1 %v4434_v0  ;;  %v398_v41 = vpop.trf.xlu1 }
 0x188   : > { %v367_v32 = vpop.trf.xlu0 }
 0x189   : > { %3180 = vmatmul.mubr.msk.f32.gmra.mxu1 %vm402_vm2, %v367_v32 }
 0x18a   : > { %652 = vmatprep.mubr.f32.mxu1 %v4434_v0  ;;  %v399_v43 = vpop.trf.xlu1 }
 0x18c   : > { %v368_v34 = vpop.trf.xlu0 }
 0x18d   : > { %3181 = vmatmul.mubr.msk.f32.gmra.mxu1 %vm402_vm2, %v368_v34 }
 0x18e   : > { %658 = vmatprep.mubr.f32.mxu1 %v4434_v0  ;;  %v400_v46 = vpop.trf.xlu1 }
 0x190   : > { %v369_v35 = vpop.trf.xlu0 }
 0x191   : > { %3182 = vmatmul.mubr.msk.f32.gmra.mxu1 %vm402_vm2, %v369_v35 }
 0x192   : > { %664 = vmatprep.mubr.f32.mxu1 %v4434_v0  ;;  %v401_v48 = vpop.trf.xlu1 }
 0x194   : > { %v777_v37 = vpop.trf.xlu0 }
 0x195   : > { %3183 = vmatmul.mubr.msk.f32.gmra.mxu1 %vm402_vm2, %v386_v11  ;;  %3201 = vmatmul.mubr.msk.f32.vlgmr.msra.gmra.mxu0 %vm402_vm2, %v777_v37 }
 0x196   : > { %670 = vmatprep.mubr.f32.mxu1 %v4434_v0  ;;  %995 = vmatprep.mubr.f32.mxu0 %v4434_v0  ;;  %v809_v51 = vpop.trf.xlu1 }
 0x198   : > { %v778_v39 = vpop.trf.xlu0 }
 0x199   : > { %3184 = vmatmul.mubr.msk.f32.gmra.mxu1 %vm402_vm2, %v387_v13  ;;  %3202 = vmatmul.mubr.msk.f32.gmra.mxu0 %vm402_vm2, %v778_v39 }
 0x19a   : > { %676 = vmatprep.mubr.f32.mxu1 %v4434_v0  ;;  %1001 = vmatprep.mubr.f32.mxu0 %v4434_v0  ;;  %v810_v53 = vpop.trf.xlu1 }
 0x19c   : > { %v779_v40 = vpop.trf.xlu0 }
 0x19d   : > { %3185 = vmatmul.mubr.msk.f32.gmra.mxu1 %vm402_vm2, %v388_v16  ;;  %3203 = vmatmul.mubr.msk.f32.gmra.mxu0 %vm402_vm2, %v779_v40 }
 0x19e   : > { %682 = vmatprep.mubr.f32.mxu1 %v4434_v0  ;;  %1007 = vmatprep.mubr.f32.mxu0 %v4434_v0  ;;  %v811_v56 = vpop.trf.xlu1 }
 0x1a0   : > { %v780_v42 = vpop.trf.xlu0 }
 0x1a1   : > { %3186 = vmatmul.mubr.msk.f32.gmra.mxu1 %vm402_vm2, %v389_v18  ;;  %3204 = vmatmul.mubr.msk.f32.gmra.mxu0 %vm402_vm2, %v780_v42 }
 0x1a2   : > { %688 = vmatprep.mubr.f32.mxu1 %v4434_v0  ;;  %1013 = vmatprep.mubr.f32.mxu0 %v4434_v0  ;;  %v812_v58 = vpop.trf.xlu1 }
 0x1a4   : > { %v781_v44 = vpop.trf.xlu0 }
 0x1a5   : > { %3187 = vmatmul.mubr.msk.f32.gmra.mxu1 %vm402_vm2, %v390_v21  ;;  %3205 = vmatmul.mubr.msk.f32.gmra.mxu0 %vm402_vm2, %v781_v44 }
 0x1a6   : > { %694 = vmatprep.mubr.f32.mxu1 %v4434_v0  ;;  %1019 = vmatprep.mubr.f32.mxu0 %v4434_v0  ;;  %v813_v61 = vpop.trf.xlu1 }
 0x1a8   : > { %v782_v45 = vpop.trf.xlu0 }
 0x1a9   : > { %3188 = vmatmul.mubr.msk.f32.gmra.mxu1 %vm402_vm2, %v391_v23  ;;  %3206 = vmatmul.mubr.msk.f32.gmra.mxu0 %vm402_vm2, %v782_v45 }
 0x1aa   : > { %700 = vmatprep.mubr.f32.mxu1 %v4434_v0  ;;  %1025 = vmatprep.mubr.f32.mxu0 %v4434_v0  ;;  %v814_v63 = vpop.trf.xlu1 }
 0x1ac   : > { %v783_v47 = vpop.trf.xlu0 }
 0x1ad   : > { %3189 = vmatmul.mubr.msk.f32.gmra.mxu1 %vm402_vm2, %v392_v26  ;;  %3207 = vmatmul.mubr.msk.f32.gmra.mxu0 %vm402_vm2, %v783_v47 }
 0x1ae   : > { %706 = vmatprep.mubr.f32.mxu1 %v4434_v0  ;;  %1031 = vmatprep.mubr.f32.mxu0 %v4434_v0  ;;  %v815_v2 = vpop.trf.xlu1 }
 0x1b0   : > { %v784_v49 = vpop.trf.xlu0 }
 0x1b1   : > { %3190 = vmatmul.mubr.msk.f32.gmra.mxu1 %vm402_vm2, %v393_v28  ;;  %3208 = vmatmul.mubr.msk.f32.gmra.mxu0 %vm402_vm2, %v784_v49 }
 0x1b2   : > { %712 = vmatprep.mubr.f32.mxu1 %v4434_v0  ;;  %1037 = vmatprep.mubr.f32.mxu0 %v4434_v0  ;;  %v816_v3 = vpop.trf.xlu1 }
 0x1b4   : > { %v785_v50 = vpop.trf.xlu0 }
 0x1b5   : > { %3191 = vmatmul.mubr.msk.f32.gmra.mxu1 %vm402_vm2, %v394_v31  ;;  %3209 = vmatmul.mubr.msk.f32.gmra.mxu0 %vm402_vm2, %v785_v50 }
 0x1b6   : > { %718 = vmatprep.mubr.f32.mxu1 %v4434_v0  ;;  %1043 = vmatprep.mubr.f32.mxu0 %v4434_v0  ;;  %v817_v4 = vpop.trf.xlu1 }
 0x1b8   : > { %v786_v52 = vpop.trf.xlu0 }
 0x1b9   : > { %3192 = vmatmul.mubr.msk.f32.gmra.mxu1 %vm402_vm2, %v395_v33  ;;  %3210 = vmatmul.mubr.msk.f32.gmra.mxu0 %vm402_vm2, %v786_v52 }
 0x1ba   : > { %724 = vmatprep.mubr.f32.mxu1 %v4434_v0  ;;  %1049 = vmatprep.mubr.f32.mxu0 %v4434_v0  ;;  %v818_v5 = vpop.trf.xlu1 }
 0x1bc   : > { %v787_v54 = vpop.trf.xlu0 }
 0x1bd   : > { %3193 = vmatmul.mubr.msk.f32.gmra.mxu1 %vm402_vm2, %v396_v36  ;;  %3211 = vmatmul.mubr.msk.f32.gmra.mxu0 %vm402_vm2, %v787_v54 }
 0x1be   : > { %730 = vmatprep.mubr.f32.mxu1 %v4434_v0  ;;  %1055 = vmatprep.mubr.f32.mxu0 %v4434_v0  ;;  %v819_v6 = vpop.trf.xlu1 }
 0x1c0   : > { %v788_v55 = vpop.trf.xlu0 }
 0x1c1   : > { %3194 = vmatmul.mubr.msk.f32.gmra.mxu1 %vm402_vm2, %v397_v38  ;;  %3212 = vmatmul.mubr.msk.f32.gmra.mxu0 %vm402_vm2, %v788_v55 }
 0x1c2   : > { %736 = vmatprep.mubr.f32.mxu1 %v4434_v0  ;;  %1061 = vmatprep.mubr.f32.mxu0 %v4434_v0  ;;  %v820_v7 = vpop.trf.xlu1 }
 0x1c4   : > { %v789_v57 = vpop.trf.xlu0 }
 0x1c5   : > { %3195 = vmatmul.mubr.msk.f32.gmra.mxu1 %vm402_vm2, %v398_v41  ;;  %3213 = vmatmul.mubr.msk.f32.gmra.mxu0 %vm402_vm2, %v789_v57 }
 0x1c6   : > { %742 = vmatprep.mubr.f32.mxu1 %v4434_v0  ;;  %1067 = vmatprep.mubr.f32.mxu0 %v4434_v0  ;;  %v821_v8 = vpop.trf.xlu1 }
 0x1c8   : > { %v790_v59 = vpop.trf.xlu0 }
 0x1c9   : > { %3196 = vmatmul.mubr.msk.f32.gmra.mxu1 %vm402_vm2, %v399_v43  ;;  %3214 = vmatmul.mubr.msk.f32.gmra.mxu0 %vm402_vm2, %v790_v59 }
 0x1ca   : > { %748 = vmatprep.mubr.f32.mxu1 %v4434_v0  ;;  %1073 = vmatprep.mubr.f32.mxu0 %v4434_v0  ;;  %v822_v9 = vpop.trf.xlu1 }
 0x1cc   : > { %v791_v60 = vpop.trf.xlu0 }
 0x1cd   : > { %3197 = vmatmul.mubr.msk.f32.gmra.mxu1 %vm402_vm2, %v400_v46  ;;  %3215 = vmatmul.mubr.msk.f32.gmra.mxu0 %vm402_vm2, %v791_v60 }
 0x1ce   : > { %754 = vmatprep.mubr.f32.mxu1 %v4434_v0  ;;  %1079 = vmatprep.mubr.f32.mxu0 %v4434_v0  ;;  %v823_v10 = vpop.trf.xlu1 }
 0x1d0   : > { %v792_v62 = vpop.trf.xlu0 }
 0x1d1   : > { %3198 = vmatmul.mubr.msk.f32.gmra.mxu1 %vm402_vm2, %v401_v48  ;;  %3216 = vmatmul.mubr.msk.f32.gmra.mxu0 %vm402_vm2, %v792_v62 }
 0x1d2   : > { %1085 = vmatprep.mubr.f32.mxu0 %v4434_v0  ;;  %1540 = vmatprep.mubr.f32.mxu1 %v4434_v0  ;;  %v824_v11 = vpop.trf.xlu1 }
 0x1d5   : > { %3217 = vmatmul.mubr.msk.f32.gmra.mxu0 %vm402_vm2, %v809_v51  ;;  %3233 = vmatmul.mubr.msk.f32.vlgmr.msra.gmra.mxu1 %vm255_vm0, %v1472_v1 }
 0x1d6   : > { %1091 = vmatprep.mubr.f32.mxu0 %v4434_v0  ;;  %1697 = vmatprep.mubr.f32.mxu1 %v4434_v0 }
 0x1d9   : > { %3218 = vmatmul.mubr.msk.f32.gmra.mxu0 %vm402_vm2, %v810_v53 }
 0x1da   : > { %1097 = vmatprep.mubr.f32.mxu0 %v4434_v0 }
 0x1dd   : > { %3219 = vmatmul.mubr.msk.f32.gmra.mxu0 %vm402_vm2, %v811_v56 }
 0x1de   : > { %1103 = vmatprep.mubr.f32.mxu0 %v4434_v0 }
 0x1e1   : > { %3220 = vmatmul.mubr.msk.f32.gmra.mxu0 %vm402_vm2, %v812_v58 }
 0x1e2   : > { %1109 = vmatprep.mubr.f32.mxu0 %v4434_v0 }
 0x1e5   : > { %3221 = vmatmul.mubr.msk.f32.gmra.mxu0 %vm402_vm2, %v813_v61 }
 0x1e6   : > { %1115 = vmatprep.mubr.f32.mxu0 %v4434_v0 }
 0x1e9   : > { %3222 = vmatmul.mubr.msk.f32.gmra.mxu0 %vm402_vm2, %v814_v63 }
 0x1ea   : > { %1121 = vmatprep.mubr.f32.mxu0 %v4434_v0 }
 0x1ed   : > { %3223 = vmatmul.mubr.msk.f32.gmra.mxu0 %vm402_vm2, %v815_v2 }
 0x1ee   : > { %1127 = vmatprep.mubr.f32.mxu0 %v4434_v0 }
 0x1f1   : > { %3224 = vmatmul.mubr.msk.f32.gmra.mxu0 %vm402_vm2, %v816_v3 }
 0x1f2   : > { %1133 = vmatprep.mubr.f32.mxu0 %v4434_v0 }
 0x1f5   : > { %3225 = vmatmul.mubr.msk.f32.gmra.mxu0 %vm402_vm2, %v817_v4 }
 0x1f6   : > { %1139 = vmatprep.mubr.f32.mxu0 %v4434_v0 }
 0x1f9   : > { %3226 = vmatmul.mubr.msk.f32.gmra.mxu0 %vm402_vm2, %v818_v5 }
 0x1fa   : > { %1145 = vmatprep.mubr.f32.mxu0 %v4434_v0 }
 0x1fd   : > { %3227 = vmatmul.mubr.msk.f32.gmra.mxu0 %vm402_vm2, %v819_v6 }
 0x1fe   : > { %1151 = vmatprep.mubr.f32.mxu0 %v4434_v0 }
 0x201   : > { %3228 = vmatmul.mubr.msk.f32.gmra.mxu0 %vm402_vm2, %v820_v7 }
 0x202   : > { %1157 = vmatprep.mubr.f32.mxu0 %v4434_v0 }
 0x205   : > { %3229 = vmatmul.mubr.msk.f32.gmra.mxu0 %vm402_vm2, %v821_v8 }
 0x206   : > { %1163 = vmatprep.mubr.f32.mxu0 %v4434_v0 }
 0x209   : > { %3230 = vmatmul.mubr.msk.f32.gmra.mxu0 %vm402_vm2, %v822_v9 }
 0x20a   : > { %1169 = vmatprep.mubr.f32.mxu0 %v4434_v0 }
 0x20d   : > { %3231 = vmatmul.mubr.msk.f32.gmra.mxu0 %vm402_vm2, %v823_v10 }
 0x20e   : > { %1175 = vmatprep.mubr.f32.mxu0 %v4434_v0 }
 0x211   : > { %3232 = vmatmul.mubr.msk.f32.gmra.mxu0 %vm402_vm2, %v824_v11 }
 0x215   : > { %v570_v12 = vpop.f32.mrf.mxu1 }
 0x217   : > { %v572_v13 = vpop.f32.mrf.mxu1 }
 0x219   : > { %v3518_v14 = vpop.f32.mrf.mxu1 }
 0x21b   : > { %v3520_v15 = vpop.f32.mrf.mxu1 }
 0x21d   : > { %v3522_v16 = vpop.f32.mrf.mxu1 }
 0x21f   : > { %v3524_v17 = vpop.f32.mrf.mxu1 }
 0x221   : > { %v3526_v18 = vpop.f32.mrf.mxu1 }
 0x223   : > { %v3528_v19 = vpop.f32.mrf.mxu1 }
 0x225   : > { %v3530_v20 = vpop.f32.mrf.mxu1 }
 0x227   : > { %v3532_v21 = vpop.f32.mrf.mxu1 }
 0x229   : > { %v3534_v22 = vpop.f32.mrf.mxu1 }
 0x22b   : > { %v3536_v23 = vpop.f32.mrf.mxu1 }
 0x22d   : > { %v3538_v24 = vpop.f32.mrf.mxu1 }
 0x22f   : > { %v3540_v25 = vpop.f32.mrf.mxu1 }
 0x231   : > { %v3542_v26 = vpop.f32.mrf.mxu1 }
 0x233   : > { %v3544_v27 = vpop.f32.mrf.mxu1 }
 0x235   : > { %v3546_v28 = vpop.f32.mrf.mxu1 }
 0x236   : > { %4510 = vst [vmem:[#allocation3_spill] sm:$0xff] %v3546_v28 }
 0x237   : > { %v3548_v29 = vpop.f32.mrf.mxu1 }
 0x238   : > { %4511 = vst [vmem:[#allocation4_spill] sm:$0xff] %v3548_v29 }
 0x239   : > { %v3550_v30 = vpop.f32.mrf.mxu1 }
 0x23a   : > { %4512 = vst [vmem:[#allocation5_spill] sm:$0xff] %v3550_v30 }
 0x23b   : > { %v3552_v31 = vpop.f32.mrf.mxu1 }
 0x23d   : > { %v3554_v32 = vpop.f32.mrf.mxu1 }
 0x23f   : > { %v3556_v33 = vpop.f32.mrf.mxu1 }
 0x241   : > { %v3558_v34 = vpop.f32.mrf.mxu1 }
 0x243   : > { %v3560_v35 = vpop.f32.mrf.mxu1 }
 0x245   : > { %v3562_v36 = vpop.f32.mrf.mxu1 }
 0x247   : > { %v3564_v37 = vpop.f32.mrf.mxu1 }
 0x249   : > { %v3566_v38 = vpop.f32.mrf.mxu1 }
 0x24b   : > { %v3568_v39 = vpop.f32.mrf.mxu1 }
 0x24d   : > { %v3570_v40 = vpop.f32.mrf.mxu1 }
 0x24f   : > { %v3572_v41 = vpop.f32.mrf.mxu1 }
 0x251   : > { %v660_v42 = vpop.f32.mrf.mxu1 }
 0x253   : > { %v3574_v43 = vpop.f32.mrf.mxu1 }
 0x255   : > { %v991_v44 = vpop.f32.mrf.mxu0  ;;  %v3576_v46 = vpop.f32.mrf.mxu1 }
 0x256   : > { %v992_v45 = vadd.f32 %v991_v44, %v570_v12  ;;  %4513 = vst [vmem:[#allocation6_spill] sm:$0xff] %v3576_v46 }
 0x257   : > { %v993_v47 = vpop.f32.mrf.mxu0  ;;  %v3578_v50 = vpop.f32.mrf.mxu1 }
 0x258   : > { %v994_v48 = vadd.f32 %v993_v47, %v572_v13  ;;  %4514 = vst [vmem:[#allocation7_spill] sm:$0xff] %v3578_v50  ;;  %v3639_v30 = vmul.f32 0.5, %v992_v45 }
 0x259   : > { %v997_v49 = vpop.f32.mrf.mxu0  ;;  %v3580_v53 = vpop.f32.mrf.mxu1 }
 0x25a   : > { %4515 = vst [vmem:[#allocation8_spill] sm:$0xff] %v3580_v53  ;;  %v998_v46 = vadd.f32 %v997_v49, %v3518_v14  ;;  %4532 = vst [vmem:[#allocation25_spill] sm:$0xff] %v3639_v30 }
 0x25b   : > { %v999_v51 = vpop.f32.mrf.mxu0  ;;  %v3582_v56 = vpop.f32.mrf.mxu1 }
 0x25c   : > { %4516 = vst [vmem:[#allocation9_spill] sm:$0xff] %v3582_v56 }
 0x25d   : > { %v1003_v52 = vpop.f32.mrf.mxu0  ;;  %v3584_v59 = vpop.f32.mrf.mxu1 }
 0x25e   : > { %4517 = vst [vmem:[#allocation10_spill] sm:$0xff] %v3584_v59 }
 0x25f   : > { %v1005_v54 = vpop.f32.mrf.mxu0  ;;  %v3590_v62 = vpop.f32.mrf.mxu1 }
 0x260   : > { %4518 = vst [vmem:[#allocation11_spill] sm:$0xff] %v3590_v62 }
 0x261   : > { %v1009_v55 = vpop.f32.mrf.mxu0  ;;  %v3596_v2 = vpop.f32.mrf.mxu1 }
 0x262   : > { %4519 = vst [vmem:[#allocation12_spill] sm:$0xff] %v3596_v2 }
 0x263   : > { %v1011_v57 = vpop.f32.mrf.mxu0  ;;  %v3602_v5 = vpop.f32.mrf.mxu1 }
 0x264   : > { %4520 = vst [vmem:[#allocation13_spill] sm:$0xff] %v3602_v5  ;;  %v1012_v14 = vadd.f32 %v1011_v57, %v3528_v19 }
 0x265   : > { %v1015_v58 = vpop.f32.mrf.mxu0  ;;  %v3608_v8 = vpop.f32.mrf.mxu1 }
 0x266   : > { %4522 = vst [vmem:[#allocation15_spill] sm:$0xff] %v3608_v8 }
 0x267   : > { %v3586_v60 = vpop.f32.mrf.mxu0  ;;  %v3614_v11 = vpop.f32.mrf.mxu1 }
 0x268   : > { %4525 = vst [vmem:[#allocation18_spill] sm:$0xff] %v3614_v11 }
 0x269   : > { %v3588_v61 = vpop.f32.mrf.mxu0  ;;  %v3620_v44 = vpop.f32.mrf.mxu1 }
 0x26a   : > { %4526 = vst [vmem:[#allocation19_spill] sm:$0xff] %v3620_v44 }
 0x26b   : > { %v3592_v63 = vpop.f32.mrf.mxu0  ;;  %v3624_v5 = vpop.f32.mrf.mxu1 }
 0x26c   : > { %4527 = vst [vmem:[#allocation20_spill] sm:$0xff] %v3624_v5  ;;  %v1006_v5 = vadd.f32 %v1005_v54, %v3524_v17 }
 0x26d   : > { %v3594_v1 = vpop.f32.mrf.mxu0  ;;  %v3626_v8 = vpop.f32.mrf.mxu1 }
 0x26e   : > { %4528 = vst [vmem:[#allocation21_spill] sm:$0xff] %v3626_v8  ;;  %v1010_v8 = vadd.f32 %v1009_v55, %v3526_v18  ;;  %v3653_v18 = vmul.f32 0.5, %v1006_v5 }
 0x26f   : > { %v3598_v3 = vpop.f32.mrf.mxu0  ;;  %v3628_v53 = vpop.f32.mrf.mxu1 }
 0x270   : > { %4529 = vst [vmem:[#allocation22_spill] sm:$0xff] %v3628_v53  ;;  %4536 = vst [vmem:[#allocation29_spill] sm:$0xff] %v3653_v18 }
 0x271   : > { %v3600_v4 = vpop.f32.mrf.mxu0  ;;  %v3632_v44 = vpop.f32.mrf.mxu1 }
 0x272   : > { %4530 = vst [vmem:[#allocation23_spill] sm:$0xff] %v3632_v44 }
 0x273   : > { %v3604_v6 = vpop.f32.mrf.mxu0  ;;  %v3644_v49 = vpop.f32.mrf.mxu1 }
 0x275   : > { %v3606_v7 = vpop.f32.mrf.mxu0 }
 0x276   : > { %4521 = vst [vmem:[#allocation14_spill] sm:$0xff] %v3606_v7  ;;  %v1004_v7 = vadd.f32 %v1003_v52, %v3522_v16  ;;  %v1016_v16 = vadd.f32 %v1015_v58, %v3530_v20  ;;  %v3651_v52 = vmul.f32 0.5, %v994_v48 }
 0x277   : > { %v3610_v9 = vpop.f32.mrf.mxu0 }
 0x278   : > { %4523 = vst [vmem:[#allocation16_spill] sm:$0xff] %v3610_v9  ;;  %v1000_v9 = vadd.f32 %v999_v51, %v3520_v15  ;;  %v3646_v44 = vmul.f32 0.5, %v1004_v7  ;;  %4535 = vst [vmem:[#allocation28_spill] sm:$0xff] %v3651_v52  ;;  %v3677_v57 = vmul.f32 0.5, %v1016_v16  ;;  %v1018_v7 = vadd.f32 %v3586_v60, %v3532_v21 }
 0x279   : > { %v3612_v10 = vpop.f32.mrf.mxu0 }
 0x27a   : > { %4524 = vst [vmem:[#allocation17_spill] sm:$0xff] %v3612_v10  ;;  %v3636_v10 = vmul.f32 0.5, %v998_v46  ;;  %v3641_v53 = vmul.f32 0.5, %v1000_v9  ;;  %4534 = vst [vmem:[#allocation27_spill] sm:$0xff] %v3646_v44 }
 0x27b   : > { %v3616_v12 = vpop.f32.mrf.mxu0  ;;  %4539 = vst [vmem:[#allocation32_spill] sm:$0xff] %v3677_v57 }
 0x27c   : > { %4531 = vst [vmem:[#allocation24_spill] sm:$0xff] %v3636_v10  ;;  %4533 = vst [vmem:[#allocation26_spill] sm:$0xff] %v3641_v53  ;;  %v1374_v19 = vadd.f32 %v3636_v10, %v3639_v30 }
 0x27d   : > { %v3618_v13 = vpop.f32.mrf.mxu0 }
 0x27e   : > { %v1375_v55 = vadd.f32 %v1374_v19, %v3646_v44  ;;  %v4548_v19 = vld [vmem:[#allocation4_spill] sm:$0xff] }
 0x27f   : > { %v3622_v47 = vpop.f32.mrf.mxu0 }
 0x281   : > { %v1057_v0 = vpop.f32.mrf.mxu0  ;;  %v4544_v16 = vld [vmem:[#allocation17_spill] sm:$0xff] }
 0x283   : > { %v1059_v2 = vpop.f32.mrf.mxu0 }
 0x285   : > { %v1063_v62 = vpop.f32.mrf.mxu0 }
 0x287   : > { %v1065_v59 = vpop.f32.mrf.mxu0 }
 0x289   : > { %v1069_v56 = vpop.f32.mrf.mxu0 }
 0x28b   : > { %v1071_v11 = vpop.f32.mrf.mxu0 }
 0x28d   : > { %v1075_v50 = vpop.f32.mrf.mxu0 }
 0x28e   : > { %v1076_v45 = vadd.f32 %v1075_v50, %v3570_v40  ;;  %v1070_v40 = vadd.f32 %v1069_v56, %v3566_v38  ;;  %v1064_v38 = vadd.f32 %v1063_v62, %v3562_v36  ;;  %v1024_v36 = vadd.f32 %v3592_v63, %v3536_v23 }
 0x28f   : > { %v1077_v29 = vpop.f32.mrf.mxu0  ;;  %v1058_v62 = vadd.f32 %v1057_v0, %v3558_v34  ;;  %v3718_v23 = vmul.f32 0.5, %v1018_v7  ;;  %v1030_v0 = vadd.f32 %v3598_v3, %v3540_v25  ;;  %v1052_v34 = vadd.f32 %v3618_v13, %v3554_v32  ;;  %v4543_v13 = vld [vmem:[#allocation5_spill] sm:$0xff] }
 0x290   : > { %v1078_v17 = vadd.f32 %v1077_v29, %v3572_v41  ;;  %v1411_v29 = vadd.f32 %v3641_v53, %v3651_v52  ;;  %v3667_v41 = vmul.f32 0.5, %v1012_v14  ;;  %v3687_v56 = vmul.f32 0.5, %v1076_v45 }
 0x291   : > { %v1081_v28 = vpop.f32.mrf.mxu0  ;;  %v3705_v14 = vmul.f32 0.5, %v1070_v40  ;;  %4540 = vst [vmem:[#allocation33_spill] sm:$0xff] %v3718_v23  ;;  %v3724_v63 = vmul.f32 0.5, %v1064_v38  ;;  %v3738_v25 = vmul.f32 0.5, %v1024_v36  ;;  %v1036_v32 = vadd.f32 %v3604_v6, %v3544_v27 }
 0x292   : > { %v1082_v15 = vadd.f32 %v1081_v28, %v660_v42  ;;  %v3660_v28 = vmul.f32 0.5, %v1010_v8  ;;  %v1072_v42 = vadd.f32 %v1071_v11, %v3568_v39  ;;  %4538 = vst [vmem:[#allocation31_spill] sm:$0xff] %v3667_v41  ;;  %v1066_v39 = vadd.f32 %v1065_v59, %v3564_v37 }
 0x293   : > { %v1083_v51 = vpop.f32.mrf.mxu0  ;;  %v3680_v58 = vmul.f32 0.5, %v1078_v17  ;;  %v1412_v5 = vadd.f32 %v1411_v29, %v3653_v18  ;;  %v1022_v37 = vadd.f32 %v3588_v61, %v3534_v22  ;;  %v1060_v59 = vadd.f32 %v1059_v2, %v3560_v35  ;;  %4542 = vst [vmem:[#allocation35_spill] sm:$0xff] %v3738_v25 }
 0x294   : > { %v1084_v46 = vadd.f32 %v1083_v51, %v3574_v43  ;;  %4537 = vst [vmem:[#allocation30_spill] sm:$0xff] %v3660_v28  ;;  %v3669_v43 = vpop.f32.mrf.mxu1  ;;  %v3672_v48 = vmul.f32 0.5, %v1082_v15  ;;  %v1376_v9 = vadd.f32 %v1375_v55, %v3660_v28  ;;  %v3696_v11 = vmul.f32 0.5, %v1072_v42  ;;  %v4549_v42 = vld [vmem:[#allocation16_spill] sm:$0xff] }
 0x295   : > { %v3656_v54 = vpop.f32.mrf.mxu0  ;;  %v1413_v21 = vadd.f32 %v1412_v5, %v3667_v41  ;;  %v1028_v35 = vadd.f32 %v3594_v1, %v3538_v24  ;;  %v1054_v61 = vadd.f32 %v3622_v47, %v3556_v33  ;;  %v3715_v2 = vmul.f32 0.5, %v1066_v39 }
 0x296   : > { %v3663_v20 = vmul.f32 0.5, %v1084_v46  ;;  %v3702_v60 = vpop.f32.mrf.mxu1  ;;  %v1377_v22 = vadd.f32 %v1376_v9, %v3677_v57  ;;  %v3729_v24 = vmul.f32 0.5, %v1022_v37  ;;  %v1034_v33 = vadd.f32 %v3600_v4, %v3542_v26  ;;  %v4546_v4 = vld [vmem:[#allocation3_spill] sm:$0xff] }
 0x297   : > { %v3674_v50 = vpop.f32.mrf.mxu0  ;;  %v1048_v1 = vadd.f32 %v3616_v12, %v3552_v31  ;;  %v3735_v47 = vmul.f32 0.5, %v1060_v59  ;;  %v1046_v17 = vadd.f32 %v4544_v16, %v4543_v13  ;;  %v3746_v46 = vmul.f32 0.5, %v1058_v62  ;;  %v4547_v12 = vld [vmem:[#allocation14_spill] sm:$0xff] }
 0x298   : > { %1549 = vmatprep.subr.mxu0 %v3663_v20  ;;  %4541 = vst [vmem:[#allocation34_spill] sm:$0xff] %v3729_v24  ;;  %v3742_v3 = vpop.f32.mrf.mxu1  ;;  %v3751_v31 = vmul.f32 0.5, %v1028_v35  ;;  %v1040_v45 = vadd.f32 %v4547_v12, %v4546_v4  ;;  %v1042_v29 = vadd.f32 %v4549_v42, %v4548_v19  ;;  %v3757_v27 = vmul.f32 0.5, %v1054_v61 }
 0x299   : > { %v3689_v8 = vpop.f32.mrf.mxu0  ;;  %1550 = vmatpush1.msra.mxu0 %v3672_v48  ;;  %v1414_v6 = vadd.f32 %v1413_v21, %v3718_v23  ;;  %v3761_v40 = vmul.f32 0.5, %v1030_v0  ;;  %v3763_v55 = vmul.f32 0.5, %v1052_v34  ;;  %v1378_v5 = vadd.f32 %v1377_v22, %v3729_v24 }
 0x29a   : > { %1551 = vmatprep.subr.mxu0 %v3680_v58  ;;  %4545 = vst [vmem:[#allocation5_spill] sm:$0xff] %v3751_v31  ;;  %v3769_v7 = vmul.f32 0.5, %v1034_v33  ;;  %v3771_v38 = vmul.f32 0.5, %v1048_v1  ;;  %v3775_v37 = vmul.f32 0.5, %v1036_v32  ;;  %v3777_v59 = vmul.f32 0.5, %v1046_v17  ;;  %v3779_v21 = vpop.f32.mrf.mxu1 }
 0x29b   : > { %v3707_v15 = vpop.f32.mrf.mxu0  ;;  %1552 = vmatpush1.msra.mxu0 %v3687_v56  ;;  %4550 = vst [vmem:[#allocation17_spill] sm:$0xff] %v3761_v40  ;;  %v1415_v9 = vadd.f32 %v1414_v6, %v3738_v25  ;;  %v1379_v62 = vadd.f32 %v1378_v5, %v3751_v31  ;;  %v3785_v22 = vmul.f32 0.5, %v1040_v45  ;;  %v3787_v35 = vmul.f32 0.5, %v1042_v29 }
 0x29c   : > { %1553 = vmatprep.subr.mxu0 %v3696_v11  ;;  %4551 = vst [vmem:[#allocation3_spill] sm:$0xff] %v3769_v7  ;;  %v3797_v1 = vpop.f32.mrf.mxu1 }
 0x29d   : > { %v3726_v51 = vpop.f32.mrf.mxu0  ;;  %1554 = vmatpush1.msra.mxu0 %v3705_v14  ;;  %v1416_v61 = vadd.f32 %v1415_v9, %v3761_v40  ;;  %v1380_v34 = vadd.f32 %v1379_v62, %v3769_v7 }
 0x29e   : > { %1555 = vmatprep.subr.mxu0 %v3715_v2  ;;  %v3809_v45 = vpop.f32.mrf.mxu1 }
 0x29f   : > { %v3748_v26 = vpop.f32.mrf.mxu0  ;;  %1556 = vmatpush1.msra.mxu0 %v3724_v63  ;;  %v1417_v33 = vadd.f32 %v1416_v61, %v3775_v37  ;;  %v1381_v13 = vadd.f32 %v1380_v34, %v3785_v22 }
 0x2a0   : > { %1557 = vmatprep.subr.mxu0 %v3735_v47  ;;  %v3818_v9 = vpop.f32.mrf.mxu1 }
 0x2a1   : > { %v3765_v39 = vpop.f32.mrf.mxu0  ;;  %1558 = vmatpush1.msra.mxu0 %v3746_v46  ;;  %v1418_v16 = vadd.f32 %v1417_v33, %v3787_v35  ;;  %v1382_v4 = vadd.f32 %v1381_v13, %v3777_v59  ;;  %v4552_v33 = vld [vmem:[#allocation6_spill] sm:$0xff] }
 0x2a2   : > { %1559 = vmatprep.subr.mxu0 %v3757_v27  ;;  %v1088_v13 = vadd.f32 %v3656_v54, %v4552_v33  ;;  %v4555_v33 = vld [vmem:[#allocation9_spill] sm:$0xff] }
 0x2a3   : > { %v3781_v36 = vpop.f32.mrf.mxu0  ;;  %1560 = vmatpush1.msra.mxu0 %v3763_v55  ;;  %v1419_v12 = vadd.f32 %v1418_v16, %v3771_v38  ;;  %v1383_v42 = vadd.f32 %v1382_v4, %v3763_v55  ;;  %v4553_v4 = vld [vmem:[#allocation7_spill] sm:$0xff] }
 0x2a4   : > { %1561 = vmatprep.subr.mxu0 %v3771_v38 }
 0x2a5   : > { %v3791_v0 = vpop.f32.mrf.mxu0  ;;  %1562 = vmatpush1.msra.mxu0 %v3777_v59  ;;  %v1420_v29 = vadd.f32 %v1419_v12, %v3757_v27  ;;  %v1384_v5 = vadd.f32 %v1383_v42, %v3746_v46  ;;  %v1090_v12 = vadd.f32 %v3674_v50, %v4553_v4  ;;  %v3841_v4 = vmul.f32 0.5, %v1088_v13  ;;  %v4561_v13 = vld [vmem:[#allocation12_spill] sm:$0xff] }
 0x2a6   : > { %1563 = vmatprep.subr.mxu0 %v3787_v35 }
 0x2a7   : > { %v3799_v32 = vpop.f32.mrf.mxu0  ;;  %1564 = vmatpush1.msra.mxu0 %v3785_v22  ;;  %v1421_v62 = vadd.f32 %v1420_v29, %v3735_v47  ;;  %v1385_v34 = vadd.f32 %v1384_v5, %v3724_v63  ;;  %v3834_v5 = vpop.f32.mrf.mxu1  ;;  %4556 = vst [vmem:[#allocation14_spill] sm:$0xff] %v3841_v4 }
 0x2a8   : > { %1565 = vmatprep.subr.mxu0 %v3775_v37 }
 0x2a9   : > { %v1117_v17 = vpop.f32.mrf.mxu0  ;;  %1566 = vmatpush1.msra.mxu0 %v3769_v7  ;;  %v1422_v16 = vadd.f32 %v1421_v62, %v3715_v2  ;;  %v1386_v29 = vadd.f32 %v1385_v34, %v3705_v14  ;;  %v1096_v62 = vadd.f32 %v3707_v15, %v4555_v33  ;;  %v4557_v34 = vld [vmem:[#allocation10_spill] sm:$0xff]  ;;  %v4577_v7 = vld [vmem:[#allocation23_spill] sm:$0xff] }
 0x2aa   : > { %1567 = vmatprep.subr.mxu0 %v3761_v40  ;;  %v4575_v40 = vld [vmem:[#allocation22_spill] sm:$0xff] }
 0x2ab   : > { %v1119_v19 = vpop.f32.mrf.mxu0  ;;  %1568 = vmatpush1.msra.mxu0 %v3751_v31  ;;  %v1423_v54 = vadd.f32 %v1422_v16, %v3696_v11  ;;  %v1387_v50 = vadd.f32 %v1386_v29, %v3687_v56  ;;  %v4559_v16 = vld [vmem:[#allocation11_spill] sm:$0xff] }
 0x2ac   : > { %1569 = vmatprep.subr.mxu0 %v3738_v25 }
 0x2ad   : > { %v1123_v6 = vpop.f32.mrf.mxu0  ;;  %1570 = vmatpush1.msra.mxu0 %v3729_v24  ;;  %v1388_v33 = vadd.f32 %v1387_v50, %v3672_v48 }
 0x2ae   : > { %1571 = vmatprep.subr.mxu0 %v3718_v23  ;;  %v4554_v23 = vld [vmem:[#allocation8_spill] sm:$0xff] }
 0x2af   : > { %v1125_v61 = vpop.f32.mrf.mxu0  ;;  %1572 = vmatpush1.msra.mxu0 %v3677_v57  ;;  %v1094_v57 = vadd.f32 %v3689_v8, %v4554_v23  ;;  %v1424_v8 = vadd.f32 %v1423_v54, %v3680_v58  ;;  %v3847_v23 = vmul.f32 0.5, %v1090_v12  ;;  %v3861_v54 = vmul.f32 0.5, %v1096_v62 }
 0x2b0   : > { %1573 = vmatprep.subr.mxu0 %v3667_v41 }
 0x2b1   : > { %v1129_v42 = vpop.f32.mrf.mxu0  ;;  %1574 = vmatpush1.msra.mxu0 %v3660_v28  ;;  %v1100_v28 = vadd.f32 %v3726_v51, %v4557_v34  ;;  %4558 = vst [vmem:[#allocation4_spill] sm:$0xff] %v3847_v23  ;;  %v3853_v29 = vmul.f32 0.5, %v1094_v57  ;;  %v3858_v51 = vpop.f32.mrf.mxu1  ;;  %v1425_v12 = vadd.f32 %v1424_v8, %v3663_v20  ;;  %4562 = vst [vmem:[#allocation6_spill] sm:$0xff] %v3861_v54  ;;  %v4563_v34 = vld [vmem:[#allocation13_spill] sm:$0xff]  ;;  %v4567_v8 = vld [vmem:[#allocation18_spill] sm:$0xff] }
 0x2b2   : > { %1575 = vmatprep.subr.mxu0 %v3653_v18  ;;  %v1102_v18 = vadd.f32 %v3748_v26, %v4559_v16  ;;  %v1108_v26 = vadd.f32 %v3781_v36, %v4563_v34  ;;  %v1389_v57 = vadd.f32 %v1388_v33, %v3841_v4  ;;  %v1114_v62 = vadd.f32 %v3799_v32, %v4567_v8  ;;  %v4573_v32 = vld [vmem:[#allocation21_spill] sm:$0xff] }
 0x2b3   : > { %v1131_v41 = vpop.f32.mrf.mxu0  ;;  %1576 = vmatpush1.msra.mxu0 %v3646_v44  ;;  %4560 = vst [vmem:[#allocation16_spill] sm:$0xff] %v3853_v29  ;;  %v1106_v44 = vadd.f32 %v3765_v39, %v4561_v13  ;;  %v3867_v50 = vmul.f32 0.5, %v1100_v28  ;;  %v1426_v13 = vadd.f32 %v1425_v12, %v3847_v23  ;;  %v740_v33 = vpop.f32.mrf.mxu1  ;;  %v1124_v8 = vadd.f32 %v1123_v6, %v4573_v32 }
 0x2b4   : > { %1577 = vmatprep.subr.mxu0 %v3641_v53  ;;  %v1390_v36 = vadd.f32 %v1389_v57, %v3853_v29  ;;  %v3881_v25 = vmul.f32 0.5, %v1108_v26  ;;  %v1132_v6 = vadd.f32 %v1131_v41, %v3644_v49 }
 0x2b5   : > { %v1135_v15 = vpop.f32.mrf.mxu0  ;;  %1578 = vmatpush1.msra.mxu0 %v3636_v10  ;;  %4564 = vst [vmem:[#allocation7_spill] sm:$0xff] %v3867_v50  ;;  %v4565_v10 = vld [vmem:[#allocation15_spill] sm:$0xff]  ;;  %v3877_v34 = vmul.f32 0.5, %v1106_v44  ;;  %v1427_v28 = vadd.f32 %v1426_v13, %v3861_v54  ;;  %v3889_v44 = vmul.f32 0.5, %v1114_v62 }
 0x2b6   : > { %1579 = vmatprep.subr.mxu0 %v3651_v52  ;;  %v1112_v39 = vadd.f32 %v3791_v0, %v4565_v10  ;;  %v3872_v52 = vmul.f32 0.5, %v1102_v18  ;;  %4570 = vst [vmem:[#allocation10_spill] sm:$0xff] %v3881_v25  ;;  %v4571_v10 = vld [vmem:[#allocation20_spill] sm:$0xff]  ;;  %v1391_v18 = vadd.f32 %v1390_v36, %v3867_v50 }
 0x2b7   : > { %v1137_v16 = vpop.f32.mrf.mxu0  ;;  %1580 = vmatpush1.msra.mxu0 %v3639_v30  ;;  %4568 = vst [vmem:[#allocation9_spill] sm:$0xff] %v3877_v34  ;;  %v4569_v30 = vld [vmem:[#allocation19_spill] sm:$0xff]  ;;  %v1120_v0 = vadd.f32 %v1119_v19, %v4571_v10  ;;  %4574 = vst [vmem:[#allocation12_spill] sm:$0xff] %v3889_v44  ;;  %v1130_v19 = vadd.f32 %v1129_v42, %v4577_v7  ;;  %v744_v10 = vpop.f32.mrf.mxu1 }
 0x2b8   : > { %4566 = vst [vmem:[#allocation8_spill] sm:$0xff] %v3872_v52  ;;  %v1118_v24 = vadd.f32 %v1117_v17, %v4569_v30  ;;  %v3885_v31 = vmul.f32 0.5, %v1112_v39  ;;  %v1428_v57 = vadd.f32 %v1427_v28, %v3872_v52  ;;  %v1126_v30 = vadd.f32 %v1125_v61, %v4575_v40 }
 0x2b9   : > { %v1141_v53 = vpop.f32.mrf.mxu0  ;;  %v1392_v13 = vadd.f32 %v1391_v18, %v3877_v34  ;;  %v3897_v39 = vmul.f32 0.5, %v1120_v0  ;;  %v3901_v28 = vmul.f32 0.5, %v1124_v8  ;;  %v1136_v40 = vadd.f32 %v1135_v15, %v3669_v43  ;;  %v746_v41 = vpop.f32.mrf.mxu1 }
 0x2ba   : > { %4572 = vst [vmem:[#allocation11_spill] sm:$0xff] %v3885_v31  ;;  %v3893_v26 = vmul.f32 0.5, %v1118_v24  ;;  %v1429_v36 = vadd.f32 %v1428_v57, %v3881_v25  ;;  %v3905_v24 = vmul.f32 0.5, %v1126_v30  ;;  %v1138_v7 = vadd.f32 %v1137_v16, %v3702_v60 }
 0x2bb   : > { %v1143_v12 = vpop.f32.mrf.mxu0  ;;  %4578 = vst [vmem:[#allocation15_spill] sm:$0xff] %v3897_v39  ;;  %v1393_v62 = vadd.f32 %v1392_v13, %v3885_v31  ;;  %4579 = vst [vmem:[#allocation18_spill] sm:$0xff] %v3901_v28  ;;  %v3909_v0 = vmul.f32 0.5, %v1130_v19  ;;  %v1142_v49 = vadd.f32 %v1141_v53, %v3742_v3  ;;  %v3913_v8 = vmul.f32 0.5, %v1132_v6 }
 0x2bc   : > { %4576 = vst [vmem:[#allocation13_spill] sm:$0xff] %v3893_v26  ;;  %v1430_v61 = vadd.f32 %v1429_v36, %v3889_v44  ;;  %4580 = vst [vmem:[#allocation19_spill] sm:$0xff] %v3905_v24  ;;  %v1144_v43 = vadd.f32 %v1143_v12, %v3779_v21  ;;  %v3917_v13 = vmul.f32 0.5, %v1136_v40  ;;  %v3921_v19 = vmul.f32 0.5, %v1138_v7  ;;  %v750_v12 = vpop.f32.mrf.mxu1 }
 0x2bd   : > { %v1147_v17 = vpop.f32.mrf.mxu0  ;;  %v1394_v18 = vadd.f32 %v1393_v62, %v3893_v26  ;;  %4581 = vst [vmem:[#allocation20_spill] sm:$0xff] %v3909_v0  ;;  %4582 = vst [vmem:[#allocation21_spill] sm:$0xff] %v3913_v8  ;;  %v3925_v6 = vmul.f32 0.5, %v1142_v49 }
 0x2be   : > { %v1431_v57 = vadd.f32 %v1430_v61, %v3897_v39  ;;  %4583 = vst [vmem:[#allocation22_spill] sm:$0xff] %v3917_v13  ;;  %v1148_v60 = vadd.f32 %v1147_v17, %v3797_v1  ;;  %4584 = vst [vmem:[#allocation23_spill] sm:$0xff] %v3921_v19  ;;  %v3929_v40 = vmul.f32 0.5, %v1144_v43 }
 0x2bf   : > { %v1149_v32 = vpop.f32.mrf.mxu0  ;;  %v1395_v30 = vadd.f32 %v1394_v18, %v3901_v28  ;;  %4585 = vst [vmem:[#allocation36_spill] sm:$0xff] %v3925_v6 }
 0x2c0   : > { %v1432_v16 = vadd.f32 %v1431_v57, %v3905_v24  ;;  %v1150_v53 = vadd.f32 %v1149_v32, %v3809_v45  ;;  %v3933_v7 = vmul.f32 0.5, %v1148_v60 }
 0x2c1   : > { %v1153_v42 = vpop.f32.mrf.mxu0  ;;  %v1396_v36 = vadd.f32 %v1395_v30, %v3909_v0  ;;  %v752_v30 = vpop.f32.mrf.mxu1 }
 0x2c2   : > { %v1154_v21 = vadd.f32 %v1153_v42, %v3818_v9  ;;  %v1433_v62 = vadd.f32 %v1432_v16, %v3913_v8  ;;  %v3937_v18 = vmul.f32 0.5, %v1150_v53 }
 0x2c3   : > { %v1155_v15 = vpop.f32.mrf.mxu0  ;;  %v1397_v61 = vadd.f32 %v1396_v36, %v3917_v13 }
 0x2c4   : > { %v1156_v1 = vadd.f32 %v1155_v15, %v3834_v5  ;;  %v1434_v32 = vadd.f32 %v1433_v62, %v3921_v19  ;;  %v3940_v42 = vmul.f32 0.5, %v1154_v21 }
 0x2c5   : > { %v1159_v3 = vpop.f32.mrf.mxu0  ;;  %v1398_v9 = vadd.f32 %v1397_v61, %v3925_v6 }
 0x2c6   : > { %v1160_v45 = vadd.f32 %v1159_v3, %v3858_v51  ;;  %v1435_v5 = vadd.f32 %v1434_v32, %v3929_v40  ;;  %v3943_v15 = vmul.f32 0.5, %v1156_v1 }
 0x2c7   : > { %v1161_v17 = vpop.f32.mrf.mxu0  ;;  %v1399_v16 = vadd.f32 %v1398_v9, %v3933_v7 }
 0x2c8   : > { %v1162_v57 = vadd.f32 %v1161_v17, %v740_v33  ;;  %v3946_v51 = vmul.f32 0.5, %v1160_v45  ;;  %v1436_v53 = vadd.f32 %v1435_v5, %v3937_v18  ;;  %v756_v17 = vpop.f32.mrf.mxu1 }
 0x2c9   : > { %v1165_v49 = vpop.f32.mrf.mxu0  ;;  %v1400_v62 = vadd.f32 %v1399_v16, %v3940_v42 }
 0x2ca   : > { %v1166_v43 = vadd.f32 %v1165_v49, %v744_v10  ;;  %v3950_v21 = vmul.f32 0.5, %v1162_v57  ;;  %v1437_v1 = vadd.f32 %v1436_v53, %v3943_v15 }
 0x2cb   : > { %v1167_v60 = vpop.f32.mrf.mxu0  ;;  %v1401_v32 = vadd.f32 %v1400_v62, %v3946_v51 }
 0x2cc   : > { %v1168_v3 = vadd.f32 %v1167_v60, %v746_v41  ;;  %v3952_v33 = vmul.f32 0.5, %v1166_v43  ;;  %v1438_v5 = vadd.f32 %v1437_v1, %v3950_v21 }
 0x2cd   : > { %v1171_v36 = vpop.f32.mrf.mxu0 }
 0x2ce   : > { %v1172_v10 = vadd.f32 %v1171_v36, %v750_v12  ;;  %v3956_v49 = vmul.f32 0.5, %v1168_v3  ;;  %v1402_v57 = vadd.f32 %v1401_v32, %v3952_v33  ;;  %v758_v12 = vpop.f32.mrf.mxu1 }
 0x2cf   : > { %v1173_v61 = vpop.f32.mrf.mxu0 }
 0x2d0   : > { %v3958_v45 = vmul.f32 0.5, %v1172_v10  ;;  %v1174_v41 = vadd.f32 %v1173_v61, %v752_v30  ;;  %v1439_v53 = vadd.f32 %v1438_v5, %v3956_v49 }
 0x2d1   : > { %v1177_v9 = vpop.f32.mrf.mxu0 }
 0x2d2   : > { %v3962_v60 = vmul.f32 0.5, %v1174_v41  ;;  %v1178_v43 = vadd.f32 %v1177_v9, %v756_v17  ;;  %v1403_v36 = vadd.f32 %v1402_v57, %v3958_v45 }
 0x2d3   : > { %v1179_v16 = vpop.f32.mrf.mxu0 }
 0x2d4   : > { %v3966_v62 = vmul.f32 0.5, %v1178_v43  ;;  %v1180_v3 = vadd.f32 %v1179_v16, %v758_v12  ;;  %v1440_v10 = vadd.f32 %v1439_v53, %v3962_v60 }
 0x2d6   : > { %v1404_v30 = vadd.f32 %v1403_v36, %v3966_v62  ;;  %v3970_v61 = vmul.f32 0.5, %v1180_v3 }
 0x2d8   : > { %v1405_v1 = vrot.slane %v1404_v30, 4  ;;  %v1441_v32 = vadd.f32 %v1440_v10, %v3970_v61  ;;  %1581 = vmatprep.subr.mxu0 %v3970_v61 }
 0x2d9   : > { %1582 = vmatpush2.msra.mxu0 %v3966_v62 }
 0x2da   : > { %v1406_v17 = vadd.f32 %v1405_v1, %v1404_v30  ;;  %v1442_v41 = vrot.slane %v1441_v32, 4  ;;  %1583 = vmatprep.subr.mxu0 %v3962_v60  ;;  %v1542_v1 = vpop.f32.mrf.mxu1 }
 0x2db   : > { %1584 = vmatpush2.msra.mxu0 %v3958_v45 }
 0x2dc   : > { %v1407_v9 = vrot.slane %v1406_v17, 2  ;;  %v1443_v5 = vadd.f32 %v1442_v41, %v1441_v32  ;;  %1585 = vmatprep.subr.mxu0 %v3956_v49  ;;  %v1544_v41 = vpop.f32.mrf.mxu1 }
 0x2dd   : > { %1586 = vmatpush2.msra.mxu0 %v3952_v33 }
 0x2de   : > { %v1408_v57 = vadd.f32 %v1407_v9, %v1406_v17  ;;  %v1444_v43 = vrot.slane %v1443_v5, 2  ;;  %1587 = vmatprep.subr.mxu0 %v3950_v21 }
 0x2df   : > { %1588 = vmatpush2.msra.mxu0 %v3946_v51 }
 0x2e0   : > { %v1409_v12 = vrot.slane %v1408_v57, 1  ;;  %v1445_v16 = vadd.f32 %v1444_v43, %v1443_v5  ;;  %1589 = vmatprep.subr.mxu0 %v3943_v15 }
 0x2e1   : > { %1590 = vmatpush2.msra.mxu0 %v3940_v42 }
 0x2e2   : > { %v1410_v53 = vadd.f32 %v1409_v12, %v1408_v57  ;;  %v1446_v36 = vrot.slane %v1445_v16, 1  ;;  %1591 = vmatprep.subr.mxu0 %v3937_v18 }
 0x2e3   : > { %1592 = vmatpush2.msra.mxu0 %v3933_v7 }
 0x2e4   : > { %vm1448_vm3 = vcmp.ne.f32.partialorder %v1410_v53, 0.0  ;;  %v1447_v3 = vadd.f32 %v1446_v36, %v1445_v16  ;;  %1593 = vmatprep.subr.mxu0 %v3929_v40 }
 0x2e5   : > { %v1450_v10 = vsel %vm1448_vm3, %v1410_v53, 1.0  ;;  %1594 = vmatpush2.msra.mxu0 %v3925_v6  ;;  %v1622_v53 = vld [vmem:[%s4430_s3] sm:$0xff] }
 0x2e6   : > { %3300 = vrcp.f32 %v1450_v10  ;;  %vm1449_vm4 = vcmp.ne.f32.partialorder %v1447_v3, 0.0  ;;  %1595 = vmatprep.subr.mxu0 %v3921_v19 }
 0x2e7   : > { %v1451_v30 = vsel %vm1449_vm4, %v1447_v3, 1.0  ;;  %1596 = vmatpush2.msra.mxu0 %v3917_v13  ;;  %v4591_v3 = vld [vmem:[#allocation5_spill] sm:$0xff] }
 0x2e8   : > { %3302 = vrcp.f32 %v1451_v30  ;;  %1597 = vmatprep.subr.mxu0 %v3913_v8 }
 0x2e9   : > { %1598 = vmatpush2.msra.mxu0 %v3909_v0 }
 0x2ea   : > { %1599 = vmatprep.subr.mxu0 %v3905_v24 }
 0x2eb   : > { %1600 = vmatpush2.msra.mxu0 %v3901_v28 }
 0x2ec   : > { %1601 = vmatprep.subr.mxu0 %v3897_v39 }
 0x2ed   : > { %1602 = vmatpush2.msra.mxu0 %v3893_v26 }
 0x2ee   : > { %1603 = vmatprep.subr.mxu0 %v3889_v44 }
 0x2ef   : > { %1604 = vmatpush2.msra.mxu0 %v3885_v31 }
 0x2f0   : > { %1605 = vmatprep.subr.mxu0 %v3881_v25 }
 0x2f1   : > { %1606 = vmatpush2.msra.mxu0 %v3877_v34 }
 0x2f2   : > { %1607 = vmatprep.subr.mxu0 %v3872_v52 }
 0x2f3   : > { %v3301_v32 = vpop.eup %3300  ;;  %1608 = vmatpush2.msra.mxu0 %v3867_v50 }
 0x2f4   : > { %1609 = vmatprep.subr.mxu0 %v3861_v54  ;;  %3304 = vrsqrt.f32 %v3301_v32  ;;  %vm1458_vm5 = vcmp.eq.f32.partialorder %v3301_v32, inf  ;;  %v1461_v43 = vand.u32 2147483648, %v3301_v32  ;;  %vm1460_vm6 = vcmp.eq.f32.partialorder %v3301_v32, 0.0 }
 0x2f5   : > { %v3303_v17 = vpop.eup %3302  ;;  %1610 = vmatpush2.msra.mxu0 %v3853_v29 }
 0x2f6   : > { %1611 = vmatprep.subr.mxu0 %v3847_v23  ;;  %3306 = vrsqrt.f32 %v3303_v17  ;;  %vm1465_vm7 = vcmp.eq.f32.partialorder %v3303_v17, inf  ;;  %v1468_v10 = vand.u32 2147483648, %v3303_v17  ;;  %vm1467_vm8 = vcmp.eq.f32.partialorder %v3303_v17, 0.0 }
 0x2f7   : > { %1612 = vmatpush2.msra.mxu0 %v3841_v4 }
 0x2f8   : > { %3237 = vmatprep.subr.msk.mxu0 %vm499_vm1, %v1544_v41 }
 0x301   : > { %v3305_v9 = vpop.eup %3304 }
 0x302   : > { %v1457_v5 = vmul.f32 %v3305_v9, %v3301_v32 }
 0x303   : > { %v3307_v57 = vpop.eup %3306 }
 0x304   : > { %v1459_v12 = vsel %vm1458_vm5, %v3301_v32, %v1457_v5  ;;  %v1464_v16 = vmul.f32 %v3307_v57, %v3303_v17  ;;  %v4588_v32 = vmov 0.0   ;;  %v4595_v5 = vld [vmem:[#allocation32_spill] sm:$0xff]  ;;  %v4596_v57 = vld [vmem:[#allocation31_spill] sm:$0xff] }
 0x305   : > { %v1462_v36 = vsel %vm1460_vm6, %v1461_v43, %v1459_v12  ;;  %v4597_v43 = vld [vmem:[#allocation30_spill] sm:$0xff]  ;;  %v4598_v12 = vld [vmem:[#allocation29_spill] sm:$0xff] }
 0x306   : > { %v1466_v30 = vsel %vm1465_vm7, %v3303_v17, %v1464_v16  ;;  %v4009_v23 = vsel %vm1448_vm3, %v1462_v36, 0.0  ;;  %v4593_v17 = vld [vmem:[#allocation34_spill] sm:$0xff]  ;;  %v4599_v16 = vld [vmem:[#allocation27_spill] sm:$0xff] }
 0x307   : > { %4586 = vst [vmem:[#allocation37_spill] sm:$0xff] %v4009_v23  ;;  %v1469_v29 = vsel %vm1467_vm8, %v1468_v10, %v1466_v30  ;;  %v1547_v54 = vmul.f32 %v1542_v1, %v4009_v23  ;;  %v4600_v36 = vld [vmem:[#allocation26_spill] sm:$0xff]  ;;  %v4601_v10 = vld [vmem:[#allocation24_spill] sm:$0xff] }
 0x308   : > { %v4012_v4 = vsel %vm1449_vm4, %v1469_v29, 0.0  ;;  %v4589_v29 = vld [vmem:[#allocation3_spill] sm:$0xff]  ;;  %v4602_v30 = vld [vmem:[#allocation28_spill] sm:$0xff] }
 0x309   : > { %4587 = vst [vmem:[#allocation38_spill] sm:$0xff] %v4012_v4  ;;  %v1548_v9 = vmul.f32 %v1544_v41, %v4012_v4  ;;  %v4594_v41 = vld [vmem:[#allocation33_spill] sm:$0xff] }
 0x30b   : > { %1613 = vmatprep.mubr.f32.mxu0 %v1548_v9  ;;  %v4603_v9 = vld [vmem:[#allocation25_spill] sm:$0xff] }
 0x30c   : > { %1614 = vmatmul.mubr.f32.vlgmr.msra.gmra.mxu0 %v1547_v54  ;;  %v4590_v54 = vld [vmem:[#allocation17_spill] sm:$0xff] }
 0x30d   : > { %3238 = vmatpush1.msk.msra.mxu0 %vm499_vm1, %v1542_v1  ;;  %1777 = vmatprep.mubr.f32.mxu0 %v4588_v32  ;;  %v4592_v1 = vld [vmem:[#allocation35_spill] sm:$0xff] }
 0x30e   : > { %1872 = vmatprep.subr.mxu0 %v3663_v20 }
 0x310   : > { %3239 = vmatmul.mubr.msk.f32.vlgmr.msra.gmra.mxu0 %vm402_vm2, %v1622_v53  ;;  %v4604_v53 = vld [vmem:[#allocation6_spill] sm:$0xff] }
 0x311   : > { %1873 = vmatpush1.msra.mxu0 %v3672_v48 }
 0x312   : > { %1874 = vmatprep.subr.mxu0 %v3680_v58 }
 0x313   : > { %1875 = vmatpush1.msra.mxu0 %v3687_v56 }
 0x314   : > { %1876 = vmatprep.subr.mxu0 %v3696_v11 }
 0x315   : > { %1877 = vmatpush1.msra.mxu0 %v3705_v14 }
 0x316   : > { %1878 = vmatprep.subr.mxu0 %v3715_v2 }
 0x317   : > { %1879 = vmatpush1.msra.mxu0 %v3724_v63 }
 0x318   : > { %1880 = vmatprep.subr.mxu0 %v3735_v47 }
 0x319   : > { %1881 = vmatpush1.msra.mxu0 %v3746_v46 }
 0x31a   : > { %1882 = vmatprep.subr.mxu0 %v3757_v27 }
 0x31b   : > { %1883 = vmatpush1.msra.mxu0 %v3763_v55 }
 0x31c   : > { %1884 = vmatprep.subr.mxu0 %v3771_v38 }
 0x31d   : > { %1885 = vmatpush1.msra.mxu0 %v3777_v59 }
 0x31e   : > { %1886 = vmatprep.subr.mxu0 %v3787_v35 }
 0x31f   : > { %1887 = vmatpush1.msra.mxu0 %v3785_v22 }
 0x320   : > { %1888 = vmatprep.subr.mxu0 %v3775_v37 }
 0x321   : > { %1889 = vmatpush1.msra.mxu0 %v4589_v29 }
 0x322   : > { %1890 = vmatprep.subr.mxu0 %v4590_v54 }
 0x323   : > { %1891 = vmatpush1.msra.mxu0 %v4591_v3 }
 0x324   : > { %1892 = vmatprep.subr.mxu0 %v4592_v1 }
 0x325   : > { %1893 = vmatpush1.msra.mxu0 %v4593_v17 }
 0x326   : > { %1894 = vmatprep.subr.mxu0 %v4594_v41 }
 0x327   : > { %1895 = vmatpush1.msra.mxu0 %v4595_v5 }
 0x328   : > { %1896 = vmatprep.subr.mxu0 %v4596_v57 }
 0x329   : > { %1897 = vmatpush1.msra.mxu0 %v4597_v43 }
 0x32a   : > { %1898 = vmatprep.subr.mxu0 %v4598_v12 }
 0x32b   : > { %1899 = vmatpush1.msra.mxu0 %v4599_v16 }
 0x32c   : > { %1900 = vmatprep.subr.mxu0 %v4600_v36 }
 0x32d   : > { %1901 = vmatpush1.msra.mxu0 %v4601_v10 }
 0x32e   : > { %1902 = vmatprep.subr.mxu0 %v4602_v30 }
 0x32f   : > { %1903 = vmatpush1.msra.mxu0 %v4603_v9 }
 0x330   : > { %1904 = vmatprep.subr.mxu0 %v3970_v61 }
 0x331   : > { %1905 = vmatpush2.msra.mxu0 %v3966_v62 }
 0x332   : > { %1906 = vmatprep.subr.mxu0 %v3962_v60 }
 0x333   : > { %1907 = vmatpush2.msra.mxu0 %v3958_v45 }
 0x334   : > { %1908 = vmatprep.subr.mxu0 %v3956_v49 }
 0x335   : > { %1909 = vmatpush2.msra.mxu0 %v3952_v33 }
 0x336   : > { %1910 = vmatprep.subr.mxu0 %v3950_v21 }
 0x337   : > { %1911 = vmatpush2.msra.mxu0 %v3946_v51 }
 0x338   : > { %1912 = vmatprep.subr.mxu0 %v3943_v15 }
 0x339   : > { %1913 = vmatpush2.msra.mxu0 %v3940_v42 }
 0x33a   : > { %1914 = vmatprep.subr.mxu0 %v3937_v18 }
 0x33b   : > { %1915 = vmatpush2.msra.mxu0 %v3933_v7 }
 0x33c   : > { %1916 = vmatprep.subr.mxu0 %v3929_v40 }
 0x33d   : > { %1917 = vmatpush2.msra.mxu0 %v3925_v6 }
 0x33e   : > { %1918 = vmatprep.subr.mxu0 %v3921_v19  ;;  %v3309_v19 = vld [vmem:[%s3373_s26] sm:$0xff] }
 0x33f   : > { %1919 = vmatpush2.msra.mxu0 %v3917_v13 }
 0x340   : > { %1920 = vmatprep.subr.mxu0 %v3913_v8  ;;  %v3308_v8 = vld [vmem:[%s3373_s26 + $0x8] sm:$0xff] }
 0x341   : > { %1921 = vmatpush2.msra.mxu0 %v3909_v0 }
 0x342   : > { %1922 = vmatprep.subr.mxu0 %v3905_v24  ;;  %v4605_v24 = vld [vmem:[#allocation16_spill] sm:$0xff] }
 0x343   : > { %1923 = vmatpush2.msra.mxu0 %v3901_v28  ;;  %v4606_v28 = vld [vmem:[#allocation4_spill] sm:$0xff] }
 0x344   : > { %1924 = vmatprep.subr.mxu0 %v3897_v39  ;;  %v4607_v39 = vld [vmem:[#allocation14_spill] sm:$0xff] }
 0x345   : > { %1925 = vmatpush2.msra.mxu0 %v3893_v26 }
 0x346   : > { %1926 = vmatprep.subr.mxu0 %v3889_v44  ;;  %v3319_v44 = vmov 0  }
 0x347   : > { %1927 = vmatpush2.msra.mxu0 %v3885_v31  ;;  %v1784_v31 = vld [vmem:[%s4432_s5] sm:$0xff]  ;;  %3298 = vset.pattern.permute.xlu0 %v3319_v44 }
 0x348   : > { %1928 = vmatprep.subr.mxu0 %v3881_v25  ;;  %3299 = vset.pattern.permute.xlu1 %v3319_v44 }
 0x349   : > { %1929 = vmatpush2.msra.mxu0 %v3877_v34  ;;  %1787 = vperm.xlu0 %3298, %v1784_v31  }
 0x34a   : > { %1930 = vmatprep.subr.mxu0 %v3872_v52 }
 0x34b   : > { %1931 = vmatpush2.msra.mxu0 %v3867_v50 }
 0x34c   : > { %1932 = vmatprep.subr.mxu0 %v4604_v53 }
 0x34d   : > { %1933 = vmatpush2.msra.mxu0 %v4605_v24 }
 0x34e   : > { %1934 = vmatprep.subr.mxu0 %v4606_v28  ;;  %v1623_v28 = vld [vmem:[%s4431_s4] sm:$0xff] }
 0x34f   : > { %1935 = vmatpush2.msra.mxu0 %v4607_v39 }
 0x3cc   : > { %v1615_v34 = vpop.f32.mrf.mxu0 }
 0x3cd   : > { %v1620_v53 = vmul.f32 %v1615_v34, %v4009_v23 }
 0x3ce   : > { %v1617_v52 = vpop.f32.mrf.mxu0 }
 0x3cf   : > { %v1621_v50 = vmul.f32 %v1617_v52, %v4012_v4  ;;  %v1788_v52 = vpop.permute.xlu0 %1787 }
 0x3d0   : > { %v1779_v31 = vpop.f32.mrf.mxu0 }
 0x3d1   : > { %3234 = vmatprep.subr.msk.mxu1 %vm499_vm1, %v1621_v50  ;;  %v3240_v50 = vld [vmem:[%s4429_s2 + $0x4] sm:$0xf] }
 0x3d2   : > { %3235 = vmatpush1.msk.msra.mxu1 %vm499_vm1, %v1620_v53  ;;  %v1781_v25 = vpop.f32.mrf.mxu0 }
 0x3d3   : > { %3236 = vmatmul.mubr.msk.f32.vlgmr.msra.gmra.mxu1 %vm402_vm2, %v1623_v28 }
 0x3d4   : > { %1863 = vmatprep.mubr.f32.mxu1 %v4588_v32 }
 0x493   : > { %v1699_v44 = vpop.f32.mrf.mxu1 }
 0x494   : > { %v1780_v39 = vadd.f32 %v1779_v31, %v1699_v44 }
 0x495   : > { %v1701_v24 = vpop.f32.mrf.mxu1 }
 0x496   : > { %v1782_v34 = vadd.f32 %v1781_v25, %v1701_v24  ;;  %v1790_v26 = vadd.f32 %v1788_v52, %v1780_v39  ;;  %v3261_v24 = vld [vmem:[%s4432_s5 + $0x10] sm:$0xff] }
 0x498   : > { %v1791_v0 = vadd.f32 %v1788_v52, %v1782_v34  ;;  %v1792_v6 = vadd.f32 %v3309_v19, %v1790_v26  ;;  %v3250_v26 = vld [vmem:[%s4432_s5 + $0x8] sm:$0xff] }
 0x499   : > { %2113 = vperm.xlu1 %3299, %v3250_v26   ;;  %v3243_v34 = vld [vmem:[%s4431_s4 + $0x8] sm:$0xff] }
 0x49a   : > { %v1793_v13 = vadd.f32 %v3308_v8, %v1791_v0  ;;  %v3272_v0 = vld [vmem:[%s4432_s5 + $0x18] sm:$0xff]  ;;  %v3283_v8 = vld [vmem:[%s4432_s5 + $0x20] sm:$0xff] }
 0x49c   : > { %1829 = vmatprep.subr.mxu1 %v1793_v13 }
 0x49d   : > { %1830 = vmatpush1.msra.mxu1 %v1792_v6  ;;  %2439 = vperm.xlu1 %3299, %v3261_v24  }
 0x49e   : > { %3241 = vmatmul.mubr.msk.f32.vlgmr.msra.gmra.mxu1 %vm255_vm0, %v3240_v50  ;;  %v3242_v50 = vld [vmem:[%s4430_s3 + $0x8] sm:$0xff] }
 0x49f   : > { %2022 = vmatprep.mubr.f32.mxu1 %v4588_v32 }
 0x4a1   : > { %2765 = vperm.xlu1 %3299, %v3272_v0  }
 0x4a5   : > { %3091 = vperm.xlu1 %3299, %v3283_v8  }
 0x514   : > { %v2114_v8 = vpop.permute.xlu1 %2113 }
 0x55e   : > { %v1865_v28 = vpop.f32.mrf.mxu1 }
 0x55f   : > { %v1870_v39 = vmul.f32 %v1865_v28, %v4009_v23 }
 0x560   : > { %v1867_v53 = vpop.f32.mrf.mxu1 }
 0x561   : > { %v1871_v25 = vmul.f32 %v1867_v53, %v4012_v4 }
 0x563   : > { %1936 = vmatprep.mubr.f32.mxu0 %v1871_v25 }
 0x564   : > { %1937 = vmatmul.mubr.f32.vlgmr.msra.gmra.mxu0 %v1870_v39 }
 0x565   : > { %2348 = vmatprep.mubr.f32.mxu0 %v4588_v32 }
 0x624   : > { %v1938_v19 = vpop.f32.mrf.mxu0 }
 0x625   : > { %v1943_v52 = vmul.f32 %v1938_v19, %v4009_v23 }
 0x626   : > { %v1940_v31 = vpop.f32.mrf.mxu0 }
 0x627   : > { %v1944_v44 = vmul.f32 %v1940_v31, %v4012_v4 }
 0x629   : > { %3244 = vmatprep.subr.msk.mxu1 %vm499_vm1, %v1944_v44 }
 0x62a   : > { %3245 = vmatpush1.msk.msra.mxu1 %vm499_vm1, %v1943_v52  ;;  %v3251_v52 = vld [vmem:[%s4429_s2 + $0x8] sm:$0xf] }
 0x62b   : > { %3246 = vmatmul.mubr.msk.f32.vlgmr.msra.gmra.mxu1 %vm402_vm2, %v3243_v34  ;;  %3247 = vmatprep.subr.msk.mxu1 %vm499_vm1, %v1867_v53  ;;  %v4610_v34 = vld [vmem:[#allocation22_spill] sm:$0xff] }
 0x62c   : > { %3248 = vmatpush1.msk.msra.mxu1 %vm499_vm1, %v1865_v28  ;;  %2102 = vmatprep.mubr.f32.mxu1 %v4588_v32 }
 0x62f   : > { %3249 = vmatmul.mubr.msk.f32.vlgmr.msra.gmra.mxu1 %vm402_vm2, %v3242_v50  ;;  %v4611_v50 = vld [vmem:[#allocation21_spill] sm:$0xff] }
 0x630   : > { %2189 = vmatprep.mubr.f32.mxu1 %v4588_v32 }
 0x6eb   : > { %v2024_v25 = vpop.f32.mrf.mxu1 }
 0x6ed   : > { %v2026_v39 = vpop.f32.mrf.mxu1 }
 0x6ef   : > { %v2104_v26 = vpop.f32.mrf.mxu1 }
 0x6f0   : > { %v2105_v24 = vadd.f32 %v2104_v26, %v2024_v25  ;;  %v4612_v25 = vld [vmem:[#allocation20_spill] sm:$0xff]  ;;  %v4614_v26 = vld [vmem:[#allocation18_spill] sm:$0xff] }
 0x6f1   : > { %v2106_v0 = vpop.f32.mrf.mxu1 }
 0x6f2   : > { %v2107_v19 = vadd.f32 %v2106_v0, %v2026_v39  ;;  %v2116_v53 = vadd.f32 %v2114_v8, %v2105_v24  ;;  %v4613_v39 = vld [vmem:[#allocation19_spill] sm:$0xff]  ;;  %v4616_v0 = vld [vmem:[#allocation13_spill] sm:$0xff] }
 0x6f3   : > { %v4615_v24 = vld [vmem:[#allocation15_spill] sm:$0xff] }
 0x6f4   : > { %v2117_v31 = vadd.f32 %v2114_v8, %v2107_v19  ;;  %v4138_v44 = vadd.f32 %v2116_v53, %v1792_v6  ;;  %v4609_v6 = vld [vmem:[#allocation23_spill] sm:$0xff]  ;;  %v4617_v8 = vld [vmem:[#allocation12_spill] sm:$0xff]  ;;  %v4619_v53 = vld [vmem:[#allocation10_spill] sm:$0xff] }
 0x6f5   : > { %v4618_v19 = vld [vmem:[#allocation11_spill] sm:$0xff] }
 0x6f6   : > { %v4136_v28 = vadd.f32 %v2117_v31, %v1793_v13  ;;  %v4608_v13 = vld [vmem:[#allocation36_spill] sm:$0xff]  ;;  %v4620_v31 = vld [vmem:[#allocation9_spill] sm:$0xff] }
 0x6f8   : > { %2155 = vmatprep.subr.mxu1 %v4136_v28 }
 0x6f9   : > { %2156 = vmatpush1.msra.mxu1 %v4138_v44 }
 0x6fa   : > { %3252 = vmatmul.mubr.msk.f32.vlgmr.msra.gmra.mxu1 %vm255_vm0, %v3251_v52  ;;  %2198 = vmatprep.subr.mxu1 %v3663_v20  ;;  %v4621_v52 = vld [vmem:[#allocation8_spill] sm:$0xff] }
 0x6fb   : > { %2199 = vmatpush1.msra.mxu1 %v3672_v48 }
 0x6fc   : > { %2200 = vmatprep.subr.mxu1 %v3680_v58 }
 0x6fd   : > { %2201 = vmatpush1.msra.mxu1 %v3687_v56 }
 0x6fe   : > { %2202 = vmatprep.subr.mxu1 %v3696_v11 }
 0x6ff   : > { %2203 = vmatpush1.msra.mxu1 %v3705_v14 }
 0x700   : > { %2204 = vmatprep.subr.mxu1 %v3715_v2 }
 0x701   : > { %2205 = vmatpush1.msra.mxu1 %v3724_v63 }
 0x702   : > { %2206 = vmatprep.subr.mxu1 %v3735_v47 }
 0x703   : > { %2207 = vmatpush1.msra.mxu1 %v3746_v46 }
 0x704   : > { %2208 = vmatprep.subr.mxu1 %v3757_v27 }
 0x705   : > { %2209 = vmatpush1.msra.mxu1 %v3763_v55 }
 0x706   : > { %2210 = vmatprep.subr.mxu1 %v3771_v38 }
 0x707   : > { %2211 = vmatpush1.msra.mxu1 %v3777_v59 }
 0x708   : > { %2212 = vmatprep.subr.mxu1 %v3787_v35 }
 0x709   : > { %2213 = vmatpush1.msra.mxu1 %v3785_v22 }
 0x70a   : > { %2214 = vmatprep.subr.mxu1 %v3775_v37 }
 0x70b   : > { %2215 = vmatpush1.msra.mxu1 %v4589_v29 }
 0x70c   : > { %2216 = vmatprep.subr.mxu1 %v4590_v54 }
 0x70d   : > { %2217 = vmatpush1.msra.mxu1 %v4591_v3 }
 0x70e   : > { %2218 = vmatprep.subr.mxu1 %v4592_v1 }
 0x70f   : > { %2219 = vmatpush1.msra.mxu1 %v4593_v17 }
 0x710   : > { %2220 = vmatprep.subr.mxu1 %v4594_v41 }
 0x711   : > { %2221 = vmatpush1.msra.mxu1 %v4595_v5 }
 0x712   : > { %2222 = vmatprep.subr.mxu1 %v4596_v57 }
 0x713   : > { %2223 = vmatpush1.msra.mxu1 %v4597_v43 }
 0x714   : > { %2224 = vmatprep.subr.mxu1 %v4598_v12 }
 0x715   : > { %2225 = vmatpush1.msra.mxu1 %v4599_v16 }
 0x716   : > { %2226 = vmatprep.subr.mxu1 %v4600_v36 }
 0x717   : > { %2227 = vmatpush1.msra.mxu1 %v4601_v10 }
 0x718   : > { %2228 = vmatprep.subr.mxu1 %v4602_v30 }
 0x719   : > { %2229 = vmatpush1.msra.mxu1 %v4603_v9 }
 0x71a   : > { %2230 = vmatprep.subr.mxu1 %v3970_v61 }
 0x71b   : > { %2231 = vmatpush2.msra.mxu1 %v3966_v62 }
 0x71c   : > { %2232 = vmatprep.subr.mxu1 %v3962_v60 }
 0x71d   : > { %2233 = vmatpush2.msra.mxu1 %v3958_v45 }
 0x71e   : > { %2234 = vmatprep.subr.mxu1 %v3956_v49 }
 0x71f   : > { %2235 = vmatpush2.msra.mxu1 %v3952_v33 }
 0x720   : > { %2236 = vmatprep.subr.mxu1 %v3950_v21 }
 0x721   : > { %2237 = vmatpush2.msra.mxu1 %v3946_v51 }
 0x722   : > { %2238 = vmatprep.subr.mxu1 %v3943_v15 }
 0x723   : > { %2239 = vmatpush2.msra.mxu1 %v3940_v42 }
 0x724   : > { %2240 = vmatprep.subr.mxu1 %v3937_v18 }
 0x725   : > { %2241 = vmatpush2.msra.mxu1 %v3933_v7 }
 0x726   : > { %2242 = vmatprep.subr.mxu1 %v3929_v40 }
 0x727   : > { %2243 = vmatpush2.msra.mxu1 %v4608_v13 }
 0x728   : > { %2244 = vmatprep.subr.mxu1 %v4609_v6 }
 0x729   : > { %2245 = vmatpush2.msra.mxu1 %v4610_v34 }
 0x72a   : > { %2246 = vmatprep.subr.mxu1 %v4611_v50  ;;  %v4622_v50 = vld [vmem:[#allocation7_spill] sm:$0xff] }
 0x72b   : > { %2247 = vmatpush2.msra.mxu1 %v4612_v25  ;;  %v4623_v25 = vld [vmem:[#allocation6_spill] sm:$0xff] }
 0x72c   : > { %2248 = vmatprep.subr.mxu1 %v4613_v39  ;;  %v4624_v39 = vld [vmem:[#allocation16_spill] sm:$0xff] }
 0x72d   : > { %2249 = vmatpush2.msra.mxu1 %v4614_v26  ;;  %v4625_v26 = vld [vmem:[#allocation4_spill] sm:$0xff] }
 0x72e   : > { %2250 = vmatprep.subr.mxu1 %v4615_v24  ;;  %v4626_v24 = vld [vmem:[#allocation14_spill] sm:$0xff] }
 0x72f   : > { %2251 = vmatpush2.msra.mxu1 %v4616_v0 }
 0x730   : > { %2252 = vmatprep.subr.mxu1 %v4617_v8 }
 0x731   : > { %2253 = vmatpush2.msra.mxu1 %v4618_v19 }
 0x732   : > { %2254 = vmatprep.subr.mxu1 %v4619_v53 }
 0x733   : > { %2255 = vmatpush2.msra.mxu1 %v4620_v31 }
 0x734   : > { %2256 = vmatprep.subr.mxu1 %v4621_v52 }
 0x735   : > { %2257 = vmatpush2.msra.mxu1 %v4622_v50 }
 0x736   : > { %2258 = vmatprep.subr.mxu1 %v4623_v25 }
 0x737   : > { %2259 = vmatpush2.msra.mxu1 %v4624_v39 }
 0x738   : > { %2260 = vmatprep.subr.mxu1 %v4625_v26 }
 0x739   : > { %2261 = vmatpush2.msra.mxu1 %v4626_v24  ;;  %v3254_v24 = vld [vmem:[%s4431_s4 + $0x10] sm:$0xff] }
 0x7ba   : > { %v2191_v0 = vpop.f32.mrf.mxu1 }
 0x7bb   : > { %v2196_v53 = vmul.f32 %v2191_v0, %v4009_v23 }
 0x7bc   : > { %v2193_v8 = vpop.f32.mrf.mxu1 }
 0x7bd   : > { %v2197_v19 = vmul.f32 %v2193_v8, %v4012_v4 }
 0x7bf   : > { %2262 = vmatprep.mubr.f32.mxu1 %v2197_v19 }
 0x7c0   : > { %2263 = vmatmul.mubr.f32.vlgmr.msra.gmra.mxu1 %v2196_v53 }
 0x7c1   : > { %2674 = vmatprep.mubr.f32.mxu1 %v4588_v32 }
 0x880   : > { %v2264_v52 = vpop.f32.mrf.mxu1 }
 0x881   : > { %v2269_v39 = vmul.f32 %v2264_v52, %v4009_v23 }
 0x882   : > { %v2266_v50 = vpop.f32.mrf.mxu1 }
 0x883   : > { %v2270_v25 = vmul.f32 %v2266_v50, %v4012_v4  ;;  %v3253_v50 = vld [vmem:[%s4430_s3 + $0x10] sm:$0xff] }
 0x885   : > { %3255 = vmatprep.subr.msk.mxu0 %vm499_vm1, %v2270_v25 }
 0x886   : > { %3256 = vmatpush1.msk.msra.mxu0 %vm499_vm1, %v2269_v39 }
 0x887   : > { %3257 = vmatmul.mubr.msk.f32.vlgmr.msra.gmra.mxu0 %vm402_vm2, %v3254_v24  ;;  %3258 = vmatprep.subr.msk.mxu0 %vm499_vm1, %v2193_v8  ;;  %v2440_v24 = vpop.permute.xlu1 %2439 }
 0x888   : > { %3259 = vmatpush1.msk.msra.mxu0 %vm499_vm1, %v2191_v0  ;;  %2428 = vmatprep.mubr.f32.mxu0 %v4588_v32 }
 0x88b   : > { %3260 = vmatmul.mubr.msk.f32.vlgmr.msra.gmra.mxu0 %vm402_vm2, %v3253_v50  ;;  %v3262_v50 = vld [vmem:[%s4429_s2 + $0xc] sm:$0xf] }
 0x88c   : > { %2515 = vmatprep.mubr.f32.mxu0 %v4588_v32 }
 0x947   : > { %v2350_v19 = vpop.f32.mrf.mxu0 }
 0x949   : > { %v2352_v25 = vpop.f32.mrf.mxu0 }
 0x94b   : > { %v2430_v53 = vpop.f32.mrf.mxu0 }
 0x94c   : > { %v2431_v39 = vadd.f32 %v2430_v53, %v2350_v19  ;;  %v4631_v19 = vld [vmem:[#allocation15_spill] sm:$0xff]  ;;  %v4633_v53 = vld [vmem:[#allocation12_spill] sm:$0xff] }
 0x94d   : > { %v2432_v52 = vpop.f32.mrf.mxu0 }
 0x94e   : > { %v2433_v23 = vadd.f32 %v2432_v52, %v2352_v25  ;;  %v2442_v8 = vadd.f32 %v2440_v24, %v2431_v39  ;;  %v4632_v25 = vld [vmem:[#allocation13_spill] sm:$0xff]  ;;  %v4634_v39 = vld [vmem:[#allocation11_spill] sm:$0xff]  ;;  %v4635_v52 = vld [vmem:[#allocation10_spill] sm:$0xff] }
 0x950   : > { %v2443_v4 = vadd.f32 %v2440_v24, %v2433_v23  ;;  %v4233_v26 = vadd.f32 %v2442_v8, %v4138_v44  ;;  %v4628_v23 = vld [vmem:[#allocation20_spill] sm:$0xff]  ;;  %v4630_v44 = vld [vmem:[#allocation18_spill] sm:$0xff]  ;;  %v4637_v8 = vld [vmem:[#allocation7_spill] sm:$0xff] }
 0x951   : > { %v4636_v24 = vld [vmem:[#allocation8_spill] sm:$0xff] }
 0x952   : > { %v4230_v0 = vadd.f32 %v2443_v4, %v4136_v28  ;;  %v4627_v4 = vld [vmem:[#allocation21_spill] sm:$0xff]  ;;  %v4629_v28 = vld [vmem:[#allocation19_spill] sm:$0xff] }
 0x954   : > { %2481 = vmatprep.subr.mxu0 %v4230_v0 }
 0x955   : > { %2482 = vmatpush1.msra.mxu0 %v4233_v26 }
 0x956   : > { %3263 = vmatmul.mubr.msk.f32.vlgmr.msra.gmra.mxu0 %vm255_vm0, %v3262_v50  ;;  %2524 = vmatprep.subr.mxu0 %v3663_v20  ;;  %v4638_v50 = vld [vmem:[#allocation6_spill] sm:$0xff] }
 0x957   : > { %2525 = vmatpush1.msra.mxu0 %v3672_v48 }
 0x958   : > { %2526 = vmatprep.subr.mxu0 %v3680_v58 }
 0x959   : > { %2527 = vmatpush1.msra.mxu0 %v3687_v56 }
 0x95a   : > { %2528 = vmatprep.subr.mxu0 %v3696_v11 }
 0x95b   : > { %2529 = vmatpush1.msra.mxu0 %v3705_v14 }
 0x95c   : > { %2530 = vmatprep.subr.mxu0 %v3715_v2 }
 0x95d   : > { %2531 = vmatpush1.msra.mxu0 %v3724_v63 }
 0x95e   : > { %2532 = vmatprep.subr.mxu0 %v3735_v47 }
 0x95f   : > { %2533 = vmatpush1.msra.mxu0 %v3746_v46 }
 0x960   : > { %2534 = vmatprep.subr.mxu0 %v3757_v27 }
 0x961   : > { %2535 = vmatpush1.msra.mxu0 %v3763_v55 }
 0x962   : > { %2536 = vmatprep.subr.mxu0 %v3771_v38 }
 0x963   : > { %2537 = vmatpush1.msra.mxu0 %v3777_v59 }
 0x964   : > { %2538 = vmatprep.subr.mxu0 %v3787_v35 }
 0x965   : > { %2539 = vmatpush1.msra.mxu0 %v3785_v22 }
 0x966   : > { %2540 = vmatprep.subr.mxu0 %v3775_v37 }
 0x967   : > { %2541 = vmatpush1.msra.mxu0 %v4589_v29 }
 0x968   : > { %2542 = vmatprep.subr.mxu0 %v4590_v54 }
 0x969   : > { %2543 = vmatpush1.msra.mxu0 %v4591_v3 }
 0x96a   : > { %2544 = vmatprep.subr.mxu0 %v4592_v1 }
 0x96b   : > { %2545 = vmatpush1.msra.mxu0 %v4593_v17 }
 0x96c   : > { %2546 = vmatprep.subr.mxu0 %v4594_v41 }
 0x96d   : > { %2547 = vmatpush1.msra.mxu0 %v4595_v5 }
 0x96e   : > { %2548 = vmatprep.subr.mxu0 %v4596_v57 }
 0x96f   : > { %2549 = vmatpush1.msra.mxu0 %v4597_v43 }
 0x970   : > { %2550 = vmatprep.subr.mxu0 %v4598_v12 }
 0x971   : > { %2551 = vmatpush1.msra.mxu0 %v4599_v16 }
 0x972   : > { %2552 = vmatprep.subr.mxu0 %v4600_v36 }
 0x973   : > { %2553 = vmatpush1.msra.mxu0 %v4601_v10 }
 0x974   : > { %2554 = vmatprep.subr.mxu0 %v4602_v30 }
 0x975   : > { %2555 = vmatpush1.msra.mxu0 %v4603_v9 }
 0x976   : > { %2556 = vmatprep.subr.mxu0 %v3970_v61 }
 0x977   : > { %2557 = vmatpush2.msra.mxu0 %v3966_v62 }
 0x978   : > { %2558 = vmatprep.subr.mxu0 %v3962_v60 }
 0x979   : > { %2559 = vmatpush2.msra.mxu0 %v3958_v45 }
 0x97a   : > { %2560 = vmatprep.subr.mxu0 %v3956_v49 }
 0x97b   : > { %2561 = vmatpush2.msra.mxu0 %v3952_v33 }
 0x97c   : > { %2562 = vmatprep.subr.mxu0 %v3950_v21 }
 0x97d   : > { %2563 = vmatpush2.msra.mxu0 %v3946_v51 }
 0x97e   : > { %2564 = vmatprep.subr.mxu0 %v3943_v15 }
 0x97f   : > { %2565 = vmatpush2.msra.mxu0 %v3940_v42 }
 0x980   : > { %2566 = vmatprep.subr.mxu0 %v3937_v18 }
 0x981   : > { %2567 = vmatpush2.msra.mxu0 %v3933_v7 }
 0x982   : > { %2568 = vmatprep.subr.mxu0 %v3929_v40 }
 0x983   : > { %2569 = vmatpush2.msra.mxu0 %v4608_v13 }
 0x984   : > { %2570 = vmatprep.subr.mxu0 %v4609_v6 }
 0x985   : > { %2571 = vmatpush2.msra.mxu0 %v4610_v34 }
 0x986   : > { %2572 = vmatprep.subr.mxu0 %v4627_v4  ;;  %v4643_v4 = vld [vmem:[#allocation37_spill] sm:$0xff] }
 0x987   : > { %2573 = vmatpush2.msra.mxu0 %v4628_v23  ;;  %v4642_v23 = vld [vmem:[#allocation38_spill] sm:$0xff] }
 0x988   : > { %2574 = vmatprep.subr.mxu0 %v4629_v28  ;;  %v4639_v28 = vld [vmem:[#allocation16_spill] sm:$0xff] }
 0x989   : > { %2575 = vmatpush2.msra.mxu0 %v4630_v44  ;;  %v4640_v44 = vld [vmem:[#allocation4_spill] sm:$0xff] }
 0x98a   : > { %2576 = vmatprep.subr.mxu0 %v4631_v19  ;;  %v4641_v19 = vld [vmem:[#allocation14_spill] sm:$0xff] }
 0x98b   : > { %2577 = vmatpush2.msra.mxu0 %v4632_v25 }
 0x98c   : > { %2578 = vmatprep.subr.mxu0 %v4633_v53 }
 0x98d   : > { %2579 = vmatpush2.msra.mxu0 %v4634_v39 }
 0x98e   : > { %2580 = vmatprep.subr.mxu0 %v4635_v52 }
 0x98f   : > { %2581 = vmatpush2.msra.mxu0 %v4620_v31 }
 0x990   : > { %2582 = vmatprep.subr.mxu0 %v4636_v24 }
 0x991   : > { %2583 = vmatpush2.msra.mxu0 %v4637_v8 }
 0x992   : > { %2584 = vmatprep.subr.mxu0 %v4638_v50 }
 0x993   : > { %2585 = vmatpush2.msra.mxu0 %v4639_v28 }
 0x994   : > { %2586 = vmatprep.subr.mxu0 %v4640_v44 }
 0x995   : > { %2587 = vmatpush2.msra.mxu0 %v4641_v19  ;;  %v3265_v19 = vld [vmem:[%s4431_s4 + $0x18] sm:$0xff] }
 0xa16   : > { %v2517_v25 = vpop.f32.mrf.mxu0 }
 0xa17   : > { %v2522_v52 = vmul.f32 %v2517_v25, %v4643_v4 }
 0xa18   : > { %v2519_v53 = vpop.f32.mrf.mxu0 }
 0xa19   : > { %v2523_v39 = vmul.f32 %v2519_v53, %v4642_v23 }
 0xa1b   : > { %2588 = vmatprep.mubr.f32.mxu0 %v2523_v39  ;;  %v3264_v39 = vld [vmem:[%s4430_s3 + $0x18] sm:$0xff] }
 0xa1c   : > { %2589 = vmatmul.mubr.f32.vlgmr.msra.gmra.mxu0 %v2522_v52 }
 0xa1d   : > { %3000 = vmatprep.mubr.f32.mxu0 %v4588_v32 }
 0xadc   : > { %v2590_v24 = vpop.f32.mrf.mxu0 }
 0xadd   : > { %v2595_v28 = vmul.f32 %v2590_v24, %v4643_v4 }
 0xade   : > { %v2592_v8 = vpop.f32.mrf.mxu0 }
 0xadf   : > { %v2596_v50 = vmul.f32 %v2592_v8, %v4642_v23 }
 0xae1   : > { %3266 = vmatprep.subr.msk.mxu1 %vm499_vm1, %v2596_v50 }
 0xae2   : > { %3267 = vmatpush1.msk.msra.mxu1 %vm499_vm1, %v2595_v28 }
 0xae3   : > { %3268 = vmatmul.mubr.msk.f32.vlgmr.msra.gmra.mxu1 %vm402_vm2, %v3265_v19  ;;  %3269 = vmatprep.subr.msk.mxu1 %vm499_vm1, %v2519_v53  ;;  %v2766_v19 = vpop.permute.xlu1 %2765 }
 0xae4   : > { %3270 = vmatpush1.msk.msra.mxu1 %vm499_vm1, %v2517_v25  ;;  %2754 = vmatprep.mubr.f32.mxu1 %v4588_v32 }
 0xae7   : > { %3271 = vmatmul.mubr.msk.f32.vlgmr.msra.gmra.mxu1 %vm402_vm2, %v3264_v39  ;;  %v3273_v39 = vld [vmem:[%s4429_s2 + $0x10] sm:$0xf] }
 0xae8   : > { %2841 = vmatprep.mubr.f32.mxu1 %v4588_v32 }
 0xba3   : > { %v2676_v52 = vpop.f32.mrf.mxu1 }
 0xba5   : > { %v2678_v24 = vpop.f32.mrf.mxu1 }
 0xba7   : > { %v2756_v8 = vpop.f32.mrf.mxu1 }
 0xba8   : > { %v2757_v28 = vadd.f32 %v2756_v8, %v2676_v52 }
 0xba9   : > { %v2758_v50 = vpop.f32.mrf.mxu1 }
 0xbaa   : > { %v2759_v4 = vadd.f32 %v2758_v50, %v2678_v24  ;;  %v2768_v53 = vadd.f32 %v2766_v19, %v2757_v28 }
 0xbac   : > { %v2769_v23 = vadd.f32 %v2766_v19, %v2759_v4  ;;  %v4328_v44 = vadd.f32 %v2768_v53, %v4233_v26 }
 0xbae   : > { %v4325_v25 = vadd.f32 %v2769_v23, %v4230_v0 }
 0xbb0   : > { %2807 = vmatprep.subr.mxu1 %v4325_v25 }
 0xbb1   : > { %2808 = vmatpush1.msra.mxu1 %v4328_v44 }
 0xbb2   : > { %3274 = vmatmul.mubr.msk.f32.vlgmr.msra.gmra.mxu1 %vm255_vm0, %v3273_v39  ;;  %2850 = vmatprep.subr.mxu1 %v3663_v20  ;;  %v4644_v20 = vld [vmem:[#allocation21_spill] sm:$0xff] }
 0xbb3   : > { %2851 = vmatpush1.msra.mxu1 %v3672_v48  ;;  %v4645_v48 = vld [vmem:[#allocation20_spill] sm:$0xff] }
 0xbb4   : > { %2852 = vmatprep.subr.mxu1 %v3680_v58  ;;  %v4646_v58 = vld [vmem:[#allocation19_spill] sm:$0xff] }
 0xbb5   : > { %2853 = vmatpush1.msra.mxu1 %v3687_v56  ;;  %v4647_v56 = vld [vmem:[#allocation18_spill] sm:$0xff] }
 0xbb6   : > { %2854 = vmatprep.subr.mxu1 %v3696_v11  ;;  %v4648_v11 = vld [vmem:[#allocation15_spill] sm:$0xff] }
 0xbb7   : > { %2855 = vmatpush1.msra.mxu1 %v3705_v14  ;;  %v4649_v14 = vld [vmem:[#allocation13_spill] sm:$0xff] }
 0xbb8   : > { %2856 = vmatprep.subr.mxu1 %v3715_v2  ;;  %v4650_v2 = vld [vmem:[#allocation12_spill] sm:$0xff] }
 0xbb9   : > { %2857 = vmatpush1.msra.mxu1 %v3724_v63  ;;  %v4651_v63 = vld [vmem:[#allocation11_spill] sm:$0xff] }
 0xbba   : > { %2858 = vmatprep.subr.mxu1 %v3735_v47  ;;  %v4652_v47 = vld [vmem:[#allocation10_spill] sm:$0xff] }
 0xbbb   : > { %2859 = vmatpush1.msra.mxu1 %v3746_v46  ;;  %v4653_v46 = vld [vmem:[#allocation8_spill] sm:$0xff] }
 0xbbc   : > { %2860 = vmatprep.subr.mxu1 %v3757_v27  ;;  %v4654_v27 = vld [vmem:[#allocation7_spill] sm:$0xff] }
 0xbbd   : > { %2861 = vmatpush1.msra.mxu1 %v3763_v55  ;;  %v4655_v55 = vld [vmem:[#allocation6_spill] sm:$0xff] }
 0xbbe   : > { %2862 = vmatprep.subr.mxu1 %v3771_v38  ;;  %v4656_v38 = vld [vmem:[#allocation16_spill] sm:$0xff] }
 0xbbf   : > { %2863 = vmatpush1.msra.mxu1 %v3777_v59  ;;  %v4658_v59 = vld [vmem:[#allocation14_spill] sm:$0xff] }
 0xbc0   : > { %2864 = vmatprep.subr.mxu1 %v3787_v35 }
 0xbc1   : > { %2865 = vmatpush1.msra.mxu1 %v3785_v22 }
 0xbc2   : > { %2866 = vmatprep.subr.mxu1 %v3775_v37  ;;  %v4657_v37 = vld [vmem:[#allocation4_spill] sm:$0xff] }
 0xbc3   : > { %2867 = vmatpush1.msra.mxu1 %v4589_v29 }
 0xbc4   : > { %2868 = vmatprep.subr.mxu1 %v4590_v54  ;;  %v3092_v54 = vpop.permute.xlu1 %3091 }
 0xbc5   : > { %2869 = vmatpush1.msra.mxu1 %v4591_v3 }
 0xbc6   : > { %2870 = vmatprep.subr.mxu1 %v4592_v1 }
 0xbc7   : > { %2871 = vmatpush1.msra.mxu1 %v4593_v17 }
 0xbc8   : > { %2872 = vmatprep.subr.mxu1 %v4594_v41 }
 0xbc9   : > { %2873 = vmatpush1.msra.mxu1 %v4595_v5 }
 0xbca   : > { %2874 = vmatprep.subr.mxu1 %v4596_v57 }
 0xbcb   : > { %2875 = vmatpush1.msra.mxu1 %v4597_v43 }
 0xbcc   : > { %2876 = vmatprep.subr.mxu1 %v4598_v12 }
 0xbcd   : > { %2877 = vmatpush1.msra.mxu1 %v4599_v16 }
 0xbce   : > { %2878 = vmatprep.subr.mxu1 %v4600_v36 }
 0xbcf   : > { %2879 = vmatpush1.msra.mxu1 %v4601_v10 }
 0xbd0   : > { %2880 = vmatprep.subr.mxu1 %v4602_v30 }
 0xbd1   : > { %2881 = vmatpush1.msra.mxu1 %v4603_v9 }
 0xbd2   : > { %2882 = vmatprep.subr.mxu1 %v3970_v61 }
 0xbd3   : > { %2883 = vmatpush2.msra.mxu1 %v3966_v62 }
 0xbd4   : > { %2884 = vmatprep.subr.mxu1 %v3962_v60 }
 0xbd5   : > { %2885 = vmatpush2.msra.mxu1 %v3958_v45  ;;  %v3275_v45 = vld [vmem:[%s4430_s3 + $0x20] sm:$0xff] }
 0xbd6   : > { %2886 = vmatprep.subr.mxu1 %v3956_v49  ;;  %v3276_v49 = vld [vmem:[%s4431_s4 + $0x20] sm:$0xff] }
 0xbd7   : > { %2887 = vmatpush2.msra.mxu1 %v3952_v33 }
 0xbd8   : > { %2888 = vmatprep.subr.mxu1 %v3950_v21 }
 0xbd9   : > { %2889 = vmatpush2.msra.mxu1 %v3946_v51 }
 0xbda   : > { %2890 = vmatprep.subr.mxu1 %v3943_v15 }
 0xbdb   : > { %2891 = vmatpush2.msra.mxu1 %v3940_v42 }
 0xbdc   : > { %2892 = vmatprep.subr.mxu1 %v3937_v18  ;;  %v4660_v18 = vld [vmem:[#allocation37_spill] sm:$0xff] }
 0xbdd   : > { %2893 = vmatpush2.msra.mxu1 %v3933_v7 }
 0xbde   : > { %2894 = vmatprep.subr.mxu1 %v3929_v40  ;;  %v4659_v40 = vld [vmem:[#allocation38_spill] sm:$0xff] }
 0xbdf   : > { %2895 = vmatpush2.msra.mxu1 %v4608_v13 }
 0xbe0   : > { %2896 = vmatprep.subr.mxu1 %v4609_v6 }
 0xbe1   : > { %2897 = vmatpush2.msra.mxu1 %v4610_v34 }
 0xbe2   : > { %2898 = vmatprep.subr.mxu1 %v4644_v20 }
 0xbe3   : > { %2899 = vmatpush2.msra.mxu1 %v4645_v48 }
 0xbe4   : > { %2900 = vmatprep.subr.mxu1 %v4646_v58 }
 0xbe5   : > { %2901 = vmatpush2.msra.mxu1 %v4647_v56 }
 0xbe6   : > { %2902 = vmatprep.subr.mxu1 %v4648_v11 }
 0xbe7   : > { %2903 = vmatpush2.msra.mxu1 %v4649_v14 }
 0xbe8   : > { %2904 = vmatprep.subr.mxu1 %v4650_v2 }
 0xbe9   : > { %2905 = vmatpush2.msra.mxu1 %v4651_v63 }
 0xbea   : > { %2906 = vmatprep.subr.mxu1 %v4652_v47 }
 0xbeb   : > { %2907 = vmatpush2.msra.mxu1 %v4620_v31 }
 0xbec   : > { %2908 = vmatprep.subr.mxu1 %v4653_v46 }
 0xbed   : > { %2909 = vmatpush2.msra.mxu1 %v4654_v27 }
 0xbee   : > { %2910 = vmatprep.subr.mxu1 %v4655_v55 }
 0xbef   : > { %2911 = vmatpush2.msra.mxu1 %v4656_v38 }
 0xbf0   : > { %2912 = vmatprep.subr.mxu1 %v4657_v37 }
 0xbf1   : > { %2913 = vmatpush2.msra.mxu1 %v4658_v59 }
 0xc72   : > { %v2843_v22 = vpop.f32.mrf.mxu1 }
 0xc73   : > { %v2848_v42 = vmul.f32 %v2843_v22, %v4660_v18 }
 0xc74   : > { %v2845_v35 = vpop.f32.mrf.mxu1 }
 0xc75   : > { %v2849_v7 = vmul.f32 %v2845_v35, %v4659_v40 }
 0xc77   : > { %2914 = vmatprep.mubr.f32.mxu1 %v2849_v7 }
 0xc78   : > { %2915 = vmatmul.mubr.f32.vlgmr.msra.gmra.mxu1 %v2848_v42 }
 0xd38   : > { %v2916_v15 = vpop.f32.mrf.mxu1 }
 0xd39   : > { %v2921_v33 = vmul.f32 %v2916_v15, %v4660_v18 }
 0xd3a   : > { %v2918_v51 = vpop.f32.mrf.mxu1 }
 0xd3b   : > { %v2922_v21 = vmul.f32 %v2918_v51, %v4659_v40 }
 0xd3d   : > { %3277 = vmatprep.subr.msk.mxu0 %vm499_vm1, %v2922_v21 }
 0xd3e   : > { %3278 = vmatpush1.msk.msra.mxu0 %vm499_vm1, %v2921_v33 }
 0xd3f   : > { %3279 = vmatmul.mubr.msk.f32.vlgmr.msra.gmra.mxu0 %vm402_vm2, %v3276_v49  ;;  %3280 = vmatprep.subr.msk.mxu0 %vm499_vm1, %v2845_v35 }
 0xd40   : > { %3281 = vmatpush1.msk.msra.mxu0 %vm499_vm1, %v2843_v22  ;;  %3080 = vmatprep.mubr.f32.mxu0 %v4588_v32 }
 0xd43   : > { %3282 = vmatmul.mubr.msk.f32.vlgmr.msra.gmra.mxu0 %vm402_vm2, %v3275_v45 }
 0xdff   : > { %v3002_v60 = vpop.f32.mrf.mxu0 }
 0xe01   : > { %v3004_v62 = vpop.f32.mrf.mxu0 }
 0xe03   : > { %v3082_v61 = vpop.f32.mrf.mxu0 }
 0xe04   : > { %v3083_v29 = vadd.f32 %v3082_v61, %v3002_v60 }
 0xe05   : > { %v3084_v3 = vpop.f32.mrf.mxu0 }
 0xe06   : > { %v3094_v1 = vadd.f32 %v3092_v54, %v3083_v29  ;;  %v3085_v17 = vadd.f32 %v3084_v3, %v3004_v62 }
 0xe08   : > { %v3096_v32 = vadd.f32 %v3094_v1, %v4328_v44  ;;  %v3095_v41 = vadd.f32 %v3092_v54, %v3085_v17 }
 0xe0a   : > { %3098 = vst [vmem:[%s251_s29] sm:$0xff] %v3096_v32  ;;  %v3097_v5 = vadd.f32 %v3095_v41, %v4325_v25 }
 0xe0c   : > { %3099 = vst [vmem:[%s251_s29 + $0x8] sm:$0xff] %v3097_v5 }
 0xe0d PF: > { %s16_s21 = sadd.s32 1, %s3316_s21  }
 0xe0e   : > { %p13_p4 = scmp.ge.s32.totalorder %s16_s21, 4  }
 0xe10   :  { %15 = sbr.rel (!%p13_p4) target bundleno = 1 (0x1), region = 90 }

</bundles_post_ra>
